<compile_context>
chip_gen: v7x
topology: tpu7x:2x2x1
jax: 0.10.0
libtpu: 0.0.40
codegen_flags: <defaults>
</compile_context>

<pallas_src>
import jax
import jax.numpy as jnp
from jax.experimental import pallas as pl
from jax.experimental.pallas import tpu as pltpu


INPUT_DIM = 1024
H1, H2, H3 = 512, 256, 128
OUTPUT_DIM = 3
OUT_PAD = 128                 # lane-dense padded width of the final layer
MAX_BLOCK_B = 1024            # batch-tile cap (v6e/v7x sweet spot)
SPLIT_THRESHOLD = 256         # above this, force >= 2 grid steps (v7x megacore)
MIN_BLOCK_B = 128             # floor for split tiles
VMEM_LIMIT_BYTES = 32 * 1024 * 1024   # makes block_b=1024 safe on v5e too


def _round_up(x, m):
    return ((x + m - 1) // m) * m


def _mlp_kernel(x_ref,
                w1_ref, b1_ref,
                w2_ref, b2_ref,
                w3_ref, b3_ref,
                w4_ref, b4_ref,
                o_ref):
    wdt = w1_ref.dtype  # dtype fed to the MXU (bf16 by default, f32 optional)

    x = x_ref[...]
    if x.dtype != wdt:          # no-op when features already arrive in bf16
        x = x.astype(wdt)

    # fc1 + relu  (f32 accumulation, f32 elementwise epilogue on the VPU)
    h = jnp.dot(x, w1_ref[...], preferred_element_type=jnp.float32)
    h = jnp.maximum(h + b1_ref[...], 0.0)
    # fc2 + relu
    h = jnp.dot(h.astype(wdt), w2_ref[...], preferred_element_type=jnp.float32)
    h = jnp.maximum(h + b2_ref[...], 0.0)
    # fc3 + relu
    h = jnp.dot(h.astype(wdt), w3_ref[...], preferred_element_type=jnp.float32)
    h = jnp.maximum(h + b3_ref[...], 0.0)
    # output layer (zero-padded to OUT_PAD lanes, no activation)
    out = jnp.dot(h.astype(wdt), w4_ref[...], preferred_element_type=jnp.float32)
    o_ref[...] = (out + b4_ref[...]).astype(o_ref.dtype)


def mlp_projector(features, params, *, block_b=None,
                  weight_dtype=jnp.bfloat16,
                  out_dtype=jnp.float32,
                  return_padded=False):
    """features: [B, INPUT_DIM] (f32 or bf16). params: (in,out) weights, (1,out) biases."""
    B, D = features.shape
    assert D == INPUT_DIM

    # ---- batch tile selection -------------------------------------------
    # bf16 packs 16 sublanes per vreg -> 16-row alignment; f32 needs 8.
    align = 16 if jnp.dtype(weight_dtype) == jnp.dtype(jnp.bfloat16) else 8
    if block_b is None:
        if B <= SPLIT_THRESHOLD:
            # small batch: one tile; splitting would only add per-step overhead
            block_b = _round_up(max(B, 1), align)
        else:
            # >= 2 grid steps so the "parallel" axis shards on v7x megacore,
            # capped at 1024 rows (x tile 4 MiB f32, 8 MiB double-buffered).
            block_b = min(MAX_BLOCK_B,
                          max(MIN_BLOCK_B, _round_up(pl.cdiv(B, 2), align)))
    block_b = max(align, _round_up(block_b, align))

    b_pad = _round_up(B, block_b)
    if b_pad != B:
        features = jnp.pad(features, ((0, b_pad - B), (0, 0)))

    # ---- weights cast to the MXU dtype; biases stay f32 (VPU epilogue) ---
    w1 = params["w1"].astype(weight_dtype)
    w2 = params["w2"].astype(weight_dtype)
    w3 = params["w3"].astype(weight_dtype)
    b1 = params["b1"].astype(jnp.float32)
    b2 = params["b2"].astype(jnp.float32)
    b3 = params["b3"].astype(jnp.float32)
    # final layer zero-padded (NOT garbage-padded) to a lane-dense 128 output
    w4 = jnp.pad(params["w4"], ((0, 0), (0, OUT_PAD - OUTPUT_DIM))).astype(weight_dtype)
    b4 = jnp.pad(params["b4"], ((0, 0), (0, OUT_PAD - OUTPUT_DIM))).astype(jnp.float32)

    grid = (b_pad // block_b,)

    def const_spec(shape):
        # whole-array block, same tile every grid step -> single-buffered
        return pl.BlockSpec(shape, lambda i: tuple(0 for _ in shape),
                            pipeline_mode=pl.Buffered(1))

    w_item = jnp.dtype(weight_dtype).itemsize
    x_item = jnp.dtype(features.dtype).itemsize
    o_item = jnp.dtype(out_dtype).itemsize
    weight_bytes = (INPUT_DIM * H1 + H1 * H2 + H2 * H3 + H3 * OUT_PAD) * w_item
    bias_bytes = (H1 + H2 + H3 + OUT_PAD) * 4
    cost = pl.CostEstimate(
        flops=2 * b_pad * (INPUT_DIM * H1 + H1 * H2 + H2 * H3 + H3 * OUT_PAD),
        transcendentals=0,
        bytes_accessed=(weight_bytes + bias_bytes
                        + b_pad * INPUT_DIM * x_item + b_pad * OUT_PAD * o_item),
    )

    out_padded = pl.pallas_call(
        _mlp_kernel,
        out_shape=jax.ShapeDtypeStruct((b_pad, OUT_PAD), out_dtype),
        grid=grid,
        in_specs=[
            pl.BlockSpec((block_b, INPUT_DIM), lambda i: (i, 0)),  # x batch tile
            const_spec(w1.shape), const_spec(b1.shape),
            const_spec(w2.shape), const_spec(b2.shape),
            const_spec(w3.shape), const_spec(b3.shape),
            const_spec(w4.shape), const_spec(b4.shape),
        ],
        out_specs=pl.BlockSpec((block_b, OUT_PAD), lambda i: (i, 0)),
        compiler_params=pltpu.CompilerParams(
            dimension_semantics=("parallel",),
            vmem_limit_bytes=VMEM_LIMIT_BYTES,
        ),
        cost_estimate=cost,
    )(features, w1, b1, w2, b2, w3, b3, w4, b4)

    if return_padded:
        # caller must ignore rows >= B and columns >= OUTPUT_DIM
        return out_padded
    # slice away the batch padding and the lane padding of the last layer
    return out_padded[:B, :OUTPUT_DIM]


def init_params(key):
    """Deterministic synthetic parameters with PyTorch Linear-like init scale."""
    def linear(key, fan_in, fan_out):
        kw, kb = jax.random.split(key)
        bound = 1.0 / jnp.sqrt(fan_in)
        w = jax.random.uniform(kw, (fan_in, fan_out), jnp.float32, -bound, bound)
        b = jax.random.uniform(kb, (1, fan_out), jnp.float32, -bound, bound)
        return w, b

    k1, k2, k3, k4 = jax.random.split(key, 4)
    w1, b1 = linear(k1, INPUT_DIM, H1)
    w2, b2 = linear(k2, H1, H2)
    w3, b3 = linear(k3, H2, H3)
    w4, b4 = linear(k4, H3, OUTPUT_DIM)
    return dict(w1=w1, b1=b1, w2=w2, b2=b2, w3=w3, b3=b3, w4=w4, b4=b4)


def mlp_reference(x, p):
    h = jax.nn.relu(x @ p["w1"] + p["b1"])
    h = jax.nn.relu(h @ p["w2"] + p["b2"])
    h = jax.nn.relu(h @ p["w3"] + p["b3"])
    return h @ p["w4"] + p["b4"]


if __name__ == "__main__":
    key = jax.random.PRNGKey(0)
    kx, kp = jax.random.split(key)
    params = init_params(kp)

    # 1) exact-dtype path: f32 weights must match the f32 reference tightly
    B = 8
    x = jax.random.normal(kx, (B, INPUT_DIM), jnp.float32)
    ref = mlp_reference(x, params)
    out_f32 = jax.block_until_ready(
        mlp_projector(x, params, weight_dtype=jnp.float32))
    assert out_f32.shape == (B, OUTPUT_DIM)
    assert jnp.allclose(out_f32, ref, atol=1e-4, rtol=1e-4), "f32 mismatch"

    # 2) performance path: bf16 weights on the MXU, f32 accumulation/epilogue
    out_bf16 = jax.block_until_ready(mlp_projector(x, params))
    assert out_bf16.shape == (B, OUTPUT_DIM)
    assert jnp.allclose(out_bf16, ref, atol=5e-2, rtol=5e-2), "bf16 weight mismatch"

    # 3) bf16 features from the upstream producer: no in-kernel cast, halves
    #    the dominant HBM read stream on v6e
    out_xbf16 = jax.block_until_ready(mlp_projector(x.astype(jnp.bfloat16), params))
    assert out_xbf16.shape == (B, OUTPUT_DIM)
    assert jnp.allclose(out_xbf16, ref, atol=1e-1, rtol=1e-1), "bf16 feature mismatch"

    # 4) auto-split grid (>=2 tiles for v7x megacore) + batch-padding path
    B2 = 300
    x2 = jax.random.normal(kx, (B2, INPUT_DIM), jnp.float32)
    ref2 = mlp_reference(x2, params)
    out2 = jax.block_until_ready(
        mlp_projector(x2, params, weight_dtype=jnp.float32))
    assert out2.shape == (B2, OUTPUT_DIM)
    assert jnp.allclose(out2, ref2, atol=1e-4, rtol=1e-4), "tiled mismatch"

    # 5) reduced-writeback path: bf16 output + padded slab (consumer slices)
    out5 = jax.block_until_ready(
        mlp_projector(x, params, out_dtype=jnp.bfloat16, return_padded=True))
    assert out5.shape[1] == OUT_PAD and out5.dtype == jnp.bfloat16
    assert jnp.allclose(out5[:B, :OUTPUT_DIM].astype(jnp.float32), ref,
                        atol=1e-1, rtol=1e-1), "bf16 out mismatch"

    print("KERNEL_OK")
</pallas_src>

<mosaic_0001>
module attributes {stable_mosaic.version = 11 : i64} {
  func.func @_mlp_kernel(%arg0: i32, %arg1: memref<8x1024xf32, #tpu.memory_space<vmem>>, %arg2: memref<1024x512xf32, #tpu.memory_space<vmem>>, %arg3: memref<1x512xf32, #tpu.memory_space<vmem>>, %arg4: memref<512x256xf32, #tpu.memory_space<vmem>>, %arg5: memref<1x256xf32, #tpu.memory_space<vmem>>, %arg6: memref<256x128xf32, #tpu.memory_space<vmem>>, %arg7: memref<1x128xf32, #tpu.memory_space<vmem>>, %arg8: memref<128x128xf32, #tpu.memory_space<vmem>>, %arg9: memref<1x128xf32, #tpu.memory_space<vmem>>, %arg10: memref<8x128xf32, #tpu.memory_space<vmem>>) attributes {dimension_semantics = [#tpu.dimension_semantics<parallel>], iteration_bounds = array<i64: 1>, scalar_prefetch = 0 : i64, scratch_operands = 0 : i64, tpu.core_type = #tpu.core_type<tc>, window_params = [{transform_indices = @transform_0, window_bounds = array<i64: 8, 1024>}, {pipeline_mode = #tpu.pipeline_mode<synchronous>, transform_indices = @transform_1, window_bounds = array<i64: 1024, 512>}, {pipeline_mode = #tpu.pipeline_mode<synchronous>, transform_indices = @transform_2, window_bounds = array<i64: 1, 512>}, {pipeline_mode = #tpu.pipeline_mode<synchronous>, transform_indices = @transform_3, window_bounds = array<i64: 512, 256>}, {pipeline_mode = #tpu.pipeline_mode<synchronous>, transform_indices = @transform_4, window_bounds = array<i64: 1, 256>}, {pipeline_mode = #tpu.pipeline_mode<synchronous>, transform_indices = @transform_5, window_bounds = array<i64: 256, 128>}, {pipeline_mode = #tpu.pipeline_mode<synchronous>, transform_indices = @transform_6, window_bounds = array<i64: 1, 128>}, {pipeline_mode = #tpu.pipeline_mode<synchronous>, transform_indices = @transform_7, window_bounds = array<i64: 128, 128>}, {pipeline_mode = #tpu.pipeline_mode<synchronous>, transform_indices = @transform_8, window_bounds = array<i64: 1, 128>}, {transform_indices = @transform_9, window_bounds = array<i64: 8, 128>}]} {
    %c0 = arith.constant 0 : index
    %c0_0 = arith.constant 0 : index
    %0 = vector.load %arg1[%c0, %c0_0] : memref<8x1024xf32, #tpu.memory_space<vmem>>, vector<8x1024xf32>
    %c0_1 = arith.constant 0 : index
    %c0_2 = arith.constant 0 : index
    %1 = vector.load %arg2[%c0_1, %c0_2] : memref<1024x512xf32, #tpu.memory_space<vmem>>, vector<1024x512xf32>
    %cst = arith.constant dense<0.000000e+00> : vector<8x512xf32>
    %2 = tpu.matmul %0, %1, %cst {dimension_numbers = #tpu.dot_dimension_numbers<[1], [0], [0], [1], [0, 0, 1, 1], [], []>} : vector<8x1024xf32>, vector<1024x512xf32>, vector<8x512xf32> -> vector<8x512xf32>
    %c0_3 = arith.constant 0 : index
    %c0_4 = arith.constant 0 : index
    %3 = vector.load %arg3[%c0_3, %c0_4] : memref<1x512xf32, #tpu.memory_space<vmem>>, vector<1x512xf32>
    %4 = vector.broadcast %3 : vector<1x512xf32> to vector<8x512xf32>
    %5 = arith.addf %2, %4 : vector<8x512xf32>
    %cst_5 = arith.constant 0.000000e+00 : f32
    %6 = vector.broadcast %cst_5 : f32 to vector<8x512xf32>
    %7 = arith.maximumf %5, %6 : vector<8x512xf32>
    %c0_6 = arith.constant 0 : index
    %c0_7 = arith.constant 0 : index
    %8 = vector.load %arg4[%c0_6, %c0_7] : memref<512x256xf32, #tpu.memory_space<vmem>>, vector<512x256xf32>
    %cst_8 = arith.constant dense<0.000000e+00> : vector<8x256xf32>
    %9 = tpu.matmul %7, %8, %cst_8 {dimension_numbers = #tpu.dot_dimension_numbers<[1], [0], [0], [1], [0, 0, 1, 1], [], []>} : vector<8x512xf32>, vector<512x256xf32>, vector<8x256xf32> -> vector<8x256xf32>
    %c0_9 = arith.constant 0 : index
    %c0_10 = arith.constant 0 : index
    %10 = vector.load %arg5[%c0_9, %c0_10] : memref<1x256xf32, #tpu.memory_space<vmem>>, vector<1x256xf32>
    %11 = vector.broadcast %10 : vector<1x256xf32> to vector<8x256xf32>
    %12 = arith.addf %9, %11 : vector<8x256xf32>
    %cst_11 = arith.constant 0.000000e+00 : f32
    %13 = vector.broadcast %cst_11 : f32 to vector<8x256xf32>
    %14 = arith.maximumf %12, %13 : vector<8x256xf32>
    %c0_12 = arith.constant 0 : index
    %c0_13 = arith.constant 0 : index
    %15 = vector.load %arg6[%c0_12, %c0_13] : memref<256x128xf32, #tpu.memory_space<vmem>>, vector<256x128xf32>
    %cst_14 = arith.constant dense<0.000000e+00> : vector<8x128xf32>
    %16 = tpu.matmul %14, %15, %cst_14 {dimension_numbers = #tpu.dot_dimension_numbers<[1], [0], [0], [1], [0, 0, 1, 1], [], []>} : vector<8x256xf32>, vector<256x128xf32>, vector<8x128xf32> -> vector<8x128xf32>
    %c0_15 = arith.constant 0 : index
    %c0_16 = arith.constant 0 : index
    %17 = vector.load %arg7[%c0_15, %c0_16] : memref<1x128xf32, #tpu.memory_space<vmem>>, vector<1x128xf32>
    %18 = vector.broadcast %17 : vector<1x128xf32> to vector<8x128xf32>
    %19 = arith.addf %16, %18 : vector<8x128xf32>
    %cst_17 = arith.constant 0.000000e+00 : f32
    %20 = vector.broadcast %cst_17 : f32 to vector<8x128xf32>
    %21 = arith.maximumf %19, %20 : vector<8x128xf32>
    %c0_18 = arith.constant 0 : index
    %c0_19 = arith.constant 0 : index
    %22 = vector.load %arg8[%c0_18, %c0_19] : memref<128x128xf32, #tpu.memory_space<vmem>>, vector<128x128xf32>
    %cst_20 = arith.constant dense<0.000000e+00> : vector<8x128xf32>
    %23 = tpu.matmul %21, %22, %cst_20 {dimension_numbers = #tpu.dot_dimension_numbers<[1], [0], [0], [1], [0, 0, 1, 1], [], []>} : vector<8x128xf32>, vector<128x128xf32>, vector<8x128xf32> -> vector<8x128xf32>
    %c0_21 = arith.constant 0 : index
    %c0_22 = arith.constant 0 : index
    %24 = vector.load %arg9[%c0_21, %c0_22] : memref<1x128xf32, #tpu.memory_space<vmem>>, vector<1x128xf32>
    %25 = vector.broadcast %24 : vector<1x128xf32> to vector<8x128xf32>
    %26 = arith.addf %23, %25 : vector<8x128xf32>
    %c0_23 = arith.constant 0 : index
    %c0_24 = arith.constant 0 : index
    %27 = vector.load %arg10[%c0_23, %c0_24] : memref<8x128xf32, #tpu.memory_space<vmem>>, vector<8x128xf32>
    tpu.vector_store %arg10[%c0_23, %c0_24], %26 {strides = array<i32>} : memref<8x128xf32, #tpu.memory_space<vmem>>, vector<8x128xf32>,
    return
  }
  func.func @transform_0(%arg0: i32) -> (i32, i32) {
    %c0_i32 = arith.constant 0 : i32
    %c0_i32_0 = arith.constant 0 : i32
    return %arg0, %c0_i32 : i32, i32
  }
  func.func @transform_1(%arg0: i32) -> (i32, i32) {
    %c0_i32 = arith.constant 0 : i32
    %c0_i32_0 = arith.constant 0 : i32
    %c0_i32_1 = arith.constant 0 : i32
    return %c0_i32, %c0_i32_0 : i32, i32
  }
  func.func @transform_2(%arg0: i32) -> (i32, i32) {
    %c0_i32 = arith.constant 0 : i32
    %c0_i32_0 = arith.constant 0 : i32
    %c0_i32_1 = arith.constant 0 : i32
    return %c0_i32, %c0_i32_0 : i32, i32
  }
  func.func @transform_3(%arg0: i32) -> (i32, i32) {
    %c0_i32 = arith.constant 0 : i32
    %c0_i32_0 = arith.constant 0 : i32
    %c0_i32_1 = arith.constant 0 : i32
    return %c0_i32, %c0_i32_0 : i32, i32
  }
  func.func @transform_4(%arg0: i32) -> (i32, i32) {
    %c0_i32 = arith.constant 0 : i32
    %c0_i32_0 = arith.constant 0 : i32
    %c0_i32_1 = arith.constant 0 : i32
    return %c0_i32, %c0_i32_0 : i32, i32
  }
  func.func @transform_5(%arg0: i32) -> (i32, i32) {
    %c0_i32 = arith.constant 0 : i32
    %c0_i32_0 = arith.constant 0 : i32
    %c0_i32_1 = arith.constant 0 : i32
    return %c0_i32, %c0_i32_0 : i32, i32
  }
  func.func @transform_6(%arg0: i32) -> (i32, i32) {
    %c0_i32 = arith.constant 0 : i32
    %c0_i32_0 = arith.constant 0 : i32
    %c0_i32_1 = arith.constant 0 : i32
    return %c0_i32, %c0_i32_0 : i32, i32
  }
  func.func @transform_7(%arg0: i32) -> (i32, i32) {
    %c0_i32 = arith.constant 0 : i32
    %c0_i32_0 = arith.constant 0 : i32
    %c0_i32_1 = arith.constant 0 : i32
    return %c0_i32, %c0_i32_0 : i32, i32
  }
  func.func @transform_8(%arg0: i32) -> (i32, i32) {
    %c0_i32 = arith.constant 0 : i32
    %c0_i32_0 = arith.constant 0 : i32
    %c0_i32_1 = arith.constant 0 : i32
    return %c0_i32, %c0_i32_0 : i32, i32
  }
  func.func @transform_9(%arg0: i32) -> (i32, i32) {
    %c0_i32 = arith.constant 0 : i32
    %c0_i32_0 = arith.constant 0 : i32
    return %arg0, %c0_i32 : i32, i32
  }
}

</mosaic_0001>

<bundles_post_ra>
// kernel: tpu_custom_call.1
= control target key start
LH: loop header
LB: loop body
LE: loop exit
PB: predicated region body
PF: predicated region fallthrough
CT: control target
= control target key end

     0   :  { %14 = vsyncpa [#allocation3], 0  ;;  %s3034_s0 = inlined_call_operand.hbm [shape: f32[8,1024], index: 0, kind: input, shape index: {}]   ;;  %s3035_s1 = inlined_call_operand.hbm [shape: f32[1024,512], index: 1, kind: input, shape index: {}]   ;;  %s3036_s2 = inlined_call_operand.hbm [shape: f32[1,512], index: 2, kind: input, shape index: {}]   ;;  %s3037_s3 = inlined_call_operand.hbm [shape: f32[512,256], index: 3, kind: input, shape index: {}]   ;;  %s3038_s4 = inlined_call_operand.hbm [shape: f32[1,256], index: 4, kind: input, shape index: {}]   ;;  %s3039_s5 = inlined_call_operand.hbm [shape: f32[256,128], index: 5, kind: input, shape index: {}]   ;;  %s3040_s6 = inlined_call_operand.hbm [shape: f32[1,128], index: 6, kind: input, shape index: {}]   ;;  %s3041_s7 = inlined_call_operand.hbm [shape: f32[128,128], index: 7, kind: input, shape index: {}]   ;;  %s3042_s8 = inlined_call_operand.hbm [shape: f32[1,128], index: 8, kind: input, shape index: {}]   ;;  %s3043_s9 = inlined_call_operand.hbm [shape: f32[8,128], index: 9, kind: output, shape index: {}]  }
   0x1   :  { %15 = vsyncpa [#allocation6], 0 }
   0x2   :  { %16 = vsyncpa [#allocation9], 0 }
   0x3   :  { %17 = vsyncpa [#allocation12], 0 }
   0x4   :  { %18 = vsyncpa [#allocation15], 0 }
   0x5   :  { %19 = vsyncpa [#allocation4], 0  ;;  %s2822_s30 = smov [#allocation5]   ;;  %s2590_s13 = scalar_lea.hbm %s3035_s1, 65536 }
   0x6   :  { %s35_s10 = sshll.u32 %s2822_s30, 4  ;;  %p2591_p0 = scmp.ne.s32.totalorder %s3035_s1, %s2590_s13  ;;  %s36_s10 = int_to_ptr.vmem [resolvable:$true] %s35_s10 }
   0x7   :  { %p2594_p1 = scmp.lt.u32.totalorder %s2590_s13, %s3035_s1 }
   0x9   :  { %p2596_p2 = pnand %p2594_p1, %p2591_p0 }
   0xb   :  { %2599 = shalt.err (!%p2596_p2)
}
   0xc   :  { %s2600_s18 = scalar_lea.vmem %s36_s10, 65536  ;;  %p2605_p4 = scmp.lt.s32.totalorder %s36_s10, %s36_s10 }
   0xd   :  { %p2601_p3 = scmp.ne.s32.totalorder %s36_s10, %s2600_s18  ;;  %p2606_p5 = scmp.lt.s32.totalorder %s2600_s18, %s2600_s18 }
   0xf   :  { %p2607_p6 = por %p2606_p5, %p2605_p4 }
  0x11   :  { %p2608_p7 = pnand %p2607_p6, %p2601_p3 }
  0x13   :  { %2611 = shalt.err (!%p2608_p7)
}
  0x14   :  { %s2823_s19 = smov 512   ;;  %s2824_s20 = smov 32  }
  0x15   :  { %41 = dma.hbm_to_vmem [thread:$0]  %s3035_s1, 65536, %s36_s10, [#allocation6], %s2823_s19, %s2823_s19, %s2824_s20  }
  0x16   :  { %s2825_s23 = smov [#allocation8]   ;;  %s2612_s27 = scalar_lea.hbm %s3037_s3, 16384 }
  0x17   :  { %s57_s24 = sshll.u32 %s2825_s23, 4  ;;  %p2613_p8 = scmp.ne.s32.totalorder %s3037_s3, %s2612_s27  ;;  %s58_s24 = int_to_ptr.vmem [resolvable:$true] %s57_s24 }
  0x18   :  { %p2616_p9 = scmp.lt.u32.totalorder %s2612_s27, %s3037_s3 }
  0x1a   :  { %p2618_p10 = pnand %p2616_p9, %p2613_p8 }
  0x1c   :  { %2621 = shalt.err (!%p2618_p10)
}
  0x1d   :  { %s2622_s12 = scalar_lea.vmem %s58_s24, 16384  ;;  %p2627_p12 = scmp.lt.s32.totalorder %s58_s24, %s58_s24 }
  0x1e   :  { %p2623_p11 = scmp.ne.s32.totalorder %s58_s24, %s2622_s12  ;;  %p2628_p13 = scmp.lt.s32.totalorder %s2622_s12, %s2622_s12 }
  0x20   :  { %p2629_p0 = por %p2628_p13, %p2627_p12 }
  0x22   :  { %p2630_p1 = pnand %p2629_p0, %p2623_p11 }
  0x24   :  { %2633 = shalt.err (!%p2630_p1)
}
  0x25   :  { %s2826_s1 = smov 256   ;;  %s2827_s10 = smov 16  }
  0x26   :  { %63 = dma.hbm_to_vmem [thread:$0]  %s3037_s3, 16384, %s58_s24, [#allocation9], %s2826_s1, %s2826_s1, %s2827_s10  }
  0x27   :  { %s2828_s15 = smov [#allocation11]   ;;  %s2634_s19 = scalar_lea.hbm %s3039_s5, 4096 }
  0x28   :  { %s79_s16 = sshll.u32 %s2828_s15, 4  ;;  %p2635_p2 = scmp.ne.s32.totalorder %s3039_s5, %s2634_s19  ;;  %s80_s16 = int_to_ptr.vmem [resolvable:$true] %s79_s16 }
  0x29   :  { %p2638_p3 = scmp.lt.u32.totalorder %s2634_s19, %s3039_s5 }
  0x2b   :  { %p2640_p4 = pnand %p2638_p3, %p2635_p2 }
  0x2d   :  { %2643 = shalt.err (!%p2640_p4)
}
  0x2e   :  { %s2644_s25 = scalar_lea.vmem %s80_s16, 4096  ;;  %p2649_p6 = scmp.lt.s32.totalorder %s80_s16, %s80_s16 }
  0x2f   :  { %p2645_p5 = scmp.ne.s32.totalorder %s80_s16, %s2644_s25  ;;  %p2650_p7 = scmp.lt.s32.totalorder %s2644_s25, %s2644_s25 }
  0x31   :  { %p2651_p8 = por %p2650_p7, %p2649_p6 }
  0x33   :  { %p2652_p9 = pnand %p2651_p8, %p2645_p5 }
  0x35   :  { %2655 = shalt.err (!%p2652_p9)
}
  0x36   :  { %s2829_s3 = smov 128   ;;  %s2830_s24 = smov 8  }
  0x37   :  { %85 = dma.hbm_to_vmem [thread:$0]  %s3039_s5, 4096, %s80_s16, [#allocation12], %s2829_s3, %s2829_s3, %s2830_s24  }
  0x38   :  { %s2831_s28 = smov [#allocation14]   ;;  %s2832_s30 = smov [#allocation2]  }
  0x39   :  { %s101_s29 = sshll.u32 %s2831_s28, 4  ;;  %s26_s11 = sshll.u32 %s2832_s30, 4  ;;  %s102_s29 = int_to_ptr.vmem [resolvable:$true] %s101_s29  ;;  %s27_s11 = int_to_ptr.vmem [resolvable:$true] %s26_s11 }
  0x3a   :  { %s2656_s10 = scalar_lea.hbm %s3041_s7, 2048 }
  0x3b   :  { %p2657_p10 = scmp.ne.s32.totalorder %s3041_s7, %s2656_s10  ;;  %p2660_p11 = scmp.lt.u32.totalorder %s2656_s10, %s3041_s7 }
  0x3d   :  { %p2662_p12 = pnand %p2660_p11, %p2657_p10 }
  0x3f   :  { %2665 = shalt.err (!%p2662_p12)
}
  0x40   :  { %s2666_s5 = scalar_lea.vmem %s102_s29, 2048  ;;  %p2671_p0 = scmp.lt.s32.totalorder %s102_s29, %s102_s29 }
  0x41   :  { %p2667_p13 = scmp.ne.s32.totalorder %s102_s29, %s2666_s5  ;;  %p2672_p1 = scmp.lt.s32.totalorder %s2666_s5, %s2666_s5 }
  0x43   :  { %p2673_p2 = por %p2672_p1, %p2671_p0 }
  0x45   :  { %p2674_p3 = pnand %p2673_p2, %p2667_p13 }
  0x47   :  { %2677 = shalt.err (!%p2674_p3)
}
  0x48   :  { %107 = dma.hbm_to_vmem [thread:$0]  %s3041_s7, 2048, %s102_s29, [#allocation15], %s2829_s3, %s2829_s3, %s2830_s24  }
  0x49   :  { %s2678_s21 = scalar_lea.hbm %s3034_s0, 1024 }
  0x4a   :  { %p2679_p4 = scmp.ne.s32.totalorder %s3034_s0, %s2678_s21  ;;  %p2682_p5 = scmp.lt.u32.totalorder %s2678_s21, %s3034_s0 }
  0x4c   :  { %p2684_p6 = pnand %p2682_p5, %p2679_p4 }
  0x4e   :  { %2687 = shalt.err (!%p2684_p6)
}
  0x4f   :  { %s2688_s27 = scalar_lea.vmem %s27_s11, 1024  ;;  %p2693_p8 = scmp.lt.s32.totalorder %s27_s11, %s27_s11 }
  0x50   :  { %p2689_p7 = scmp.ne.s32.totalorder %s27_s11, %s2688_s27  ;;  %p2694_p9 = scmp.lt.s32.totalorder %s2688_s27, %s2688_s27 }
  0x52   :  { %p2695_p10 = por %p2694_p9, %p2693_p8 }
  0x54   :  { %p2696_p11 = pnand %p2695_p10, %p2689_p7 }
  0x56   :  { %2699 = shalt.err (!%p2696_p11)
}
  0x57   :  { %29 = dma.hbm_to_vmem [thread:$0]  %s3034_s0, 1024, %s27_s11, [#allocation3]  }
  0x58   :  { %s2833_s24 = smov [#allocation7]   ;;  %s2834_s29 = smov [#allocation10]  }
  0x59   :  { %s48_s28 = sshll.u32 %s2833_s24, 4  ;;  %s70_s30 = sshll.u32 %s2834_s29, 4  ;;  %s49_s28 = int_to_ptr.vmem [resolvable:$true] %s48_s28  ;;  %s71_s30 = int_to_ptr.vmem [resolvable:$true] %s70_s30 }
  0x5a   :  { %s2700_s10 = scalar_lea.hbm %s3036_s2, 64 }
  0x5b   :  { %p2701_p12 = scmp.ne.s32.totalorder %s3036_s2, %s2700_s10  ;;  %p2704_p13 = scmp.lt.u32.totalorder %s2700_s10, %s3036_s2 }
  0x5d   :  { %p2706_p0 = pnand %p2704_p13, %p2701_p12 }
  0x5f   :  { %2709 = shalt.err (!%p2706_p0)
}
  0x60   :  { %s2710_s0 = scalar_lea.vmem %s49_s28, 64  ;;  %p2715_p2 = scmp.lt.s32.totalorder %s49_s28, %s49_s28 }
  0x61   :  { %p2711_p1 = scmp.ne.s32.totalorder %s49_s28, %s2710_s0  ;;  %p2716_p3 = scmp.lt.s32.totalorder %s2710_s0, %s2710_s0 }
  0x63   :  { %p2717_p4 = por %p2716_p3, %p2715_p2 }
  0x65   :  { %p2718_p5 = pnand %p2717_p4, %p2711_p1 }
  0x67   :  { %2721 = shalt.err (!%p2718_p5)
}
  0x68   :  { %51 = dma.hbm_to_vmem [thread:$0]  %s3036_s2, 64, %s49_s28, [#allocation6]  }
  0x69   :  { %s2722_s19 = scalar_lea.hbm %s3038_s4, 32 }
  0x6a   :  { %p2723_p6 = scmp.ne.s32.totalorder %s3038_s4, %s2722_s19  ;;  %p2726_p7 = scmp.lt.u32.totalorder %s2722_s19, %s3038_s4 }
  0x6c   :  { %p2728_p8 = pnand %p2726_p7, %p2723_p6 }
  0x6e   :  { %2731 = shalt.err (!%p2728_p8)
}
  0x6f   :  { %s2732_s25 = scalar_lea.vmem %s71_s30, 32  ;;  %p2737_p10 = scmp.lt.s32.totalorder %s71_s30, %s71_s30 }
  0x70   :  { %p2733_p9 = scmp.ne.s32.totalorder %s71_s30, %s2732_s25  ;;  %p2738_p11 = scmp.lt.s32.totalorder %s2732_s25, %s2732_s25 }
  0x72   :  { %p2739_p12 = por %p2738_p11, %p2737_p10 }
  0x74   :  { %p2740_p13 = pnand %p2739_p12, %p2733_p9 }
  0x76   :  { %2743 = shalt.err (!%p2740_p13)
}
  0x77   :  { %73 = dma.hbm_to_vmem [thread:$0]  %s3038_s4, 32, %s71_s30, [#allocation9]  }
  0x78   :  { %s2835_s27 = smov [#allocation13]   ;;  %s2836_s3 = smov [#allocation16]  }
  0x79   :  { %s92_s7 = sshll.u32 %s2835_s27, 4  ;;  %s114_s24 = sshll.u32 %s2836_s3, 4  ;;  %s93_s7 = int_to_ptr.vmem [resolvable:$true] %s92_s7  ;;  %s115_s24 = int_to_ptr.vmem [resolvable:$true] %s114_s24 }
  0x7a   :  { %s2744_s12 = scalar_lea.hbm %s3040_s6, 16 }
  0x7b   :  { %p2745_p0 = scmp.ne.s32.totalorder %s3040_s6, %s2744_s12  ;;  %p2748_p1 = scmp.lt.u32.totalorder %s2744_s12, %s3040_s6 }
  0x7d   :  { %p2750_p2 = pnand %p2748_p1, %p2745_p0 }
  0x7f   :  { %2753 = shalt.err (!%p2750_p2)
}
  0x80   :  { %s2754_s4 = scalar_lea.vmem %s93_s7, 16  ;;  %s2758_s30 = scalar_lea.vmem %s93_s7, 32 }
  0x81   :  { %p2755_p3 = scmp.ne.s32.totalorder %s93_s7, %s2754_s4  ;;  %p2759_p4 = scmp.lt.s32.totalorder %s93_s7, %s93_s7 }
  0x82   :  { %p2760_p5 = scmp.lt.s32.totalorder %s2758_s30, %s2754_s4 }
  0x84   :  { %p2761_p6 = por %p2760_p5, %p2759_p4 }
  0x86   :  { %p2762_p7 = pnand %p2761_p6, %p2755_p3 }
  0x88   :  { %2765 = shalt.err (!%p2762_p7)
}
  0x89   :  { %95 = dma.hbm_to_vmem [thread:$0]  %s3040_s6, 16, %s93_s7, [#allocation12]  }
  0x8a   :  { %s2766_s5 = scalar_lea.hbm %s3042_s8, 16 }
  0x8b   :  { %p2767_p8 = scmp.ne.s32.totalorder %s3042_s8, %s2766_s5  ;;  %p2770_p9 = scmp.lt.u32.totalorder %s2766_s5, %s3042_s8 }
  0x8d   :  { %p2772_p10 = pnand %p2770_p9, %p2767_p8 }
  0x8f   :  { %2775 = shalt.err (!%p2772_p10)
}
  0x90   :  { %s2776_s21 = scalar_lea.vmem %s115_s24, 16  ;;  %s2780_s22 = scalar_lea.vmem %s115_s24, 32 }
  0x91   :  { %p2777_p11 = scmp.ne.s32.totalorder %s115_s24, %s2776_s21  ;;  %p2781_p12 = scmp.lt.s32.totalorder %s115_s24, %s115_s24 }
  0x92   :  { %p2782_p13 = scmp.lt.s32.totalorder %s2780_s22, %s2776_s21 }
  0x94   :  { %p2783_p0 = por %p2782_p13, %p2781_p12 }
  0x96   :  { %p2784_p1 = pnand %p2783_p0, %p2777_p11 }
  0x98   :  { %2787 = shalt.err (!%p2784_p1)
}
  0x99   :  { %117 = dma.hbm_to_vmem [thread:$0]  %s3042_s8, 16, %s115_s24, [#allocation15]  }
  0x9a   :  { %2810 = dma.done.wait [#allocation3], 1024  }
  0x9b   :  { %2811 = vsyncadd [#allocation3], 4294966272 }
  0x9c   :  { %2812 = dma.done.wait [#allocation6], 65600  }
  0x9d   :  { %2813 = vsyncadd [#allocation6], 4294901696 }
  0x9e   :  { %2814 = dma.done.wait [#allocation9], 16416  }
  0x9f   :  { %2815 = vsyncadd [#allocation9], 4294950880 }
  0xa0   :  { %2816 = dma.done.wait [#allocation12], 4112  }
  0xa1   :  { %2817 = vsyncadd [#allocation12], 4294963184 }
  0xa2   :  { %2818 = dma.done.wait [#allocation15], 2064  }
  0xa3   :  { %2819 = vsyncadd [#allocation15], 4294965232  ;;  %v154_v0 = vld [vmem:[#allocation5 + $0x8] sm:$0xff]  ;;  %v156_v2 = vld [vmem:[#allocation5 + $0x18] sm:$0xff]  ;;  %vm2838_vm0 = vmmov 0   ;;  %s2840_s8 = smov [#allocation17]  }
  0xa4   :  { %v158_v1 = vld [vmem:[#allocation5 + $0x28] sm:$0xff]  ;;  %v160_v4 = vld [vmem:[#allocation5 + $0x38] sm:$0xff]  ;;  %v153_v5 = vld [vmem:[#allocation5] sm:$0xff]  ;;  %s1753_s25 = sshll.u32 %s2840_s8, 4  ;;  %s1754_s25 = int_to_ptr.vmem [resolvable:$true] %s1753_s25 }
  0xa5   :  { %v1855_v3 = vpack.c.bf16 %v158_v1, %v154_v0  ;;  %v157_v6 = vld [vmem:[#allocation5 + $0x20] sm:$0xff]  ;;  %v2111_v7 = vpack.c.bf16 %v160_v4, %v156_v2  ;;  %v155_v9 = vld [vmem:[#allocation5 + $0x10] sm:$0xff]  ;;  %v162_v11 = vld [vmem:[#allocation5 + $0x48] sm:$0xff]  ;;  %s2788_s2 = scalar_lea.vmem %s1754_s25, 128  ;;  %p2793_p3 = scmp.lt.s32.totalorder %s1754_s25, %s1754_s25 }
  0xa6   :  { %v1857_v8 = vpack.c.bf16 %v157_v6, %v153_v5  ;;  %v159_v10 = vld [vmem:[#allocation5 + $0x30] sm:$0xff]  ;;  %v166_v13 = vld [vmem:[#allocation5 + $0x68] sm:$0xff]  ;;  %v164_v14 = vld [vmem:[#allocation5 + $0x58] sm:$0xff]  ;;  %p2789_p2 = scmp.ne.s32.totalorder %s1754_s25, %s2788_s2  ;;  %p2794_p4 = scmp.lt.s32.totalorder %s2788_s2, %s2788_s2 }
  0xa7   :  { %1856 = vmatprep.subr.bf16.mxu0 %v1855_v3  ;;  %v2113_v12 = vpack.c.bf16 %v159_v10, %v155_v9  ;;  %v168_v15 = vld [vmem:[#allocation5 + $0x78] sm:$0xff]  ;;  %2112 = vmatprep.subr.bf16.mxu1 %v2111_v7  ;;  %v1859_v16 = vpack.c.bf16 %v166_v13, %v162_v11  ;;  %v161_v18 = vld [vmem:[#allocation5 + $0x40] sm:$0xff]  ;;  %v163_v20 = vld [vmem:[#allocation5 + $0x50] sm:$0xff] }
  0xa8   :  { %1858 = vmatpush1.bf16.msra.mxu0 %v1857_v8  ;;  %v2115_v17 = vpack.c.bf16 %v168_v15, %v164_v14  ;;  %v165_v19 = vld [vmem:[#allocation5 + $0x60] sm:$0xff]  ;;  %v167_v22 = vld [vmem:[#allocation5 + $0x70] sm:$0xff]  ;;  %v170_v23 = vld [vmem:[#allocation5 + $0x88] sm:$0xff]  ;;  %p2795_p5 = por %p2794_p4, %p2793_p3 }
  0xa9   :  { %2114 = vmatpush1.bf16.msra.mxu1 %v2113_v12  ;;  %v1861_v21 = vpack.c.bf16 %v165_v19, %v161_v18  ;;  %v174_v24 = vld [vmem:[#allocation5 + $0xa8] sm:$0xff]  ;;  %1860 = vmatprep.subr.bf16.mxu0 %v1859_v16  ;;  %v2117_v25 = vpack.c.bf16 %v167_v22, %v163_v20  ;;  %v172_v27 = vld [vmem:[#allocation5 + $0x98] sm:$0xff]  ;;  %v169_v29 = vld [vmem:[#allocation5 + $0x80] sm:$0xff] }
  0xaa   :  { %2116 = vmatprep.subr.bf16.mxu1 %v2115_v17  ;;  %v1863_v26 = vpack.c.bf16 %v174_v24, %v170_v23  ;;  %v176_v28 = vld [vmem:[#allocation5 + $0xb8] sm:$0xff]  ;;  %v173_v31 = vld [vmem:[#allocation5 + $0xa0] sm:$0xff]  ;;  %v171_v32 = vld [vmem:[#allocation5 + $0x90] sm:$0xff]  ;;  %p2796_p6 = pnand %p2795_p5, %p2789_p2 }
  0xab   :  { %v2119_v30 = vpack.c.bf16 %v176_v28, %v172_v27  ;;  %v175_v33 = vld [vmem:[#allocation5 + $0xb0] sm:$0xff]  ;;  %v1865_v34 = vpack.c.bf16 %v173_v31, %v169_v29  ;;  %v178_v35 = vld [vmem:[#allocation5 + $0xc8] sm:$0xff]  ;;  %v180_v37 = vld [vmem:[#allocation5 + $0xd8] sm:$0xff] }
  0xac   :  { %1862 = vmatpush1.bf16.msra.mxu0 %v1861_v21  ;;  %v182_v36 = vld [vmem:[#allocation5 + $0xe8] sm:$0xff]  ;;  %v2121_v38 = vpack.c.bf16 %v175_v33, %v171_v32  ;;  %v184_v40 = vld [vmem:[#allocation5 + $0xf8] sm:$0xff]  ;;  %v177_v41 = vld [vmem:[#allocation5 + $0xc0] sm:$0xff] }
  0xad   :  { %2118 = vmatpush1.bf16.msra.mxu1 %v2117_v25  ;;  %1864 = vmatprep.subr.bf16.mxu0 %v1863_v26  ;;  %v1867_v39 = vpack.c.bf16 %v182_v36, %v178_v35  ;;  %v181_v42 = vld [vmem:[#allocation5 + $0xe0] sm:$0xff]  ;;  %v2123_v43 = vpack.c.bf16 %v184_v40, %v180_v37  ;;  %v179_v44 = vld [vmem:[#allocation5 + $0xd0] sm:$0xff]  ;;  %v186_v46 = vld [vmem:[#allocation5 + $0x108] sm:$0xff] }
  0xae   :  { %2120 = vmatprep.subr.bf16.mxu1 %v2119_v30  ;;  %v183_v45 = vld [vmem:[#allocation5 + $0xf0] sm:$0xff]  ;;  %v190_v47 = vld [vmem:[#allocation5 + $0x128] sm:$0xff]  ;;  %v188_v48 = vld [vmem:[#allocation5 + $0x118] sm:$0xff]  ;;  %v1869_v50 = vpack.c.bf16 %v181_v42, %v177_v41 }
  0xaf   :  { %v192_v49 = vld [vmem:[#allocation5 + $0x138] sm:$0xff]  ;;  %v2125_v51 = vpack.c.bf16 %v183_v45, %v179_v44  ;;  %v1871_v52 = vpack.c.bf16 %v190_v47, %v186_v46  ;;  %v185_v53 = vld [vmem:[#allocation5 + $0x100] sm:$0xff]  ;;  %v187_v55 = vld [vmem:[#allocation5 + $0x110] sm:$0xff] }
  0xb0   :  { %1866 = vmatpush1.bf16.msra.mxu0 %v1865_v34  ;;  %v189_v54 = vld [vmem:[#allocation5 + $0x120] sm:$0xff]  ;;  %v2127_v56 = vpack.c.bf16 %v192_v49, %v188_v48  ;;  %v191_v57 = vld [vmem:[#allocation5 + $0x130] sm:$0xff]  ;;  %v194_v58 = vld [vmem:[#allocation5 + $0x148] sm:$0xff] }
  0xb1   :  { %2122 = vmatpush1.bf16.msra.mxu1 %v2121_v38  ;;  %1868 = vmatprep.subr.bf16.mxu0 %v1867_v39  ;;  %v198_v59 = vld [vmem:[#allocation5 + $0x168] sm:$0xff]  ;;  %v196_v60 = vld [vmem:[#allocation5 + $0x158] sm:$0xff]  ;;  %v1873_v62 = vpack.c.bf16 %v189_v54, %v185_v53  ;;  %v2129_v63 = vpack.c.bf16 %v191_v57, %v187_v55  ;;  %v193_v1 = vld [vmem:[#allocation5 + $0x140] sm:$0xff] }
  0xb2   :  { %2124 = vmatprep.subr.bf16.mxu1 %v2123_v43  ;;  %v200_v61 = vld [vmem:[#allocation5 + $0x178] sm:$0xff]  ;;  %v1875_v0 = vpack.c.bf16 %v198_v59, %v194_v58  ;;  %v197_v2 = vld [vmem:[#allocation5 + $0x160] sm:$0xff]  ;;  %v195_v3 = vld [vmem:[#allocation5 + $0x150] sm:$0xff] }
  0xb3   :  { %v2131_v4 = vpack.c.bf16 %v200_v61, %v196_v60  ;;  %v199_v5 = vld [vmem:[#allocation5 + $0x170] sm:$0xff]  ;;  %v202_v6 = vld [vmem:[#allocation5 + $0x188] sm:$0xff]  ;;  %v204_v8 = vld [vmem:[#allocation5 + $0x198] sm:$0xff]  ;;  %v1877_v10 = vpack.c.bf16 %v197_v2, %v193_v1 }
  0xb4   :  { %1870 = vmatpush1.bf16.msra.mxu0 %v1869_v50  ;;  %v206_v7 = vld [vmem:[#allocation5 + $0x1a8] sm:$0xff]  ;;  %v208_v9 = vld [vmem:[#allocation5 + $0x1b8] sm:$0xff]  ;;  %v2133_v11 = vpack.c.bf16 %v199_v5, %v195_v3  ;;  %v201_v13 = vld [vmem:[#allocation5 + $0x180] sm:$0xff] }
  0xb5   :  { %2126 = vmatpush1.bf16.msra.mxu1 %v2125_v51  ;;  %1872 = vmatprep.subr.bf16.mxu0 %v1871_v52  ;;  %v1879_v12 = vpack.c.bf16 %v206_v7, %v202_v6  ;;  %v205_v14 = vld [vmem:[#allocation5 + $0x1a0] sm:$0xff]  ;;  %v203_v15 = vld [vmem:[#allocation5 + $0x190] sm:$0xff]  ;;  %v2135_v16 = vpack.c.bf16 %v208_v9, %v204_v8  ;;  %v210_v18 = vld [vmem:[#allocation5 + $0x1c8] sm:$0xff] }
  0xb6   :  { %2128 = vmatprep.subr.bf16.mxu1 %v2127_v56  ;;  %v207_v17 = vld [vmem:[#allocation5 + $0x1b0] sm:$0xff]  ;;  %v214_v19 = vld [vmem:[#allocation5 + $0x1e8] sm:$0xff]  ;;  %v212_v20 = vld [vmem:[#allocation5 + $0x1d8] sm:$0xff]  ;;  %v1881_v22 = vpack.c.bf16 %v205_v14, %v201_v13 }
  0xb7   :  { %v216_v21 = vld [vmem:[#allocation5 + $0x1f8] sm:$0xff]  ;;  %v2137_v23 = vpack.c.bf16 %v207_v17, %v203_v15  ;;  %v1883_v24 = vpack.c.bf16 %v214_v19, %v210_v18  ;;  %v209_v25 = vld [vmem:[#allocation5 + $0x1c0] sm:$0xff]  ;;  %v211_v27 = vld [vmem:[#allocation5 + $0x1d0] sm:$0xff] }
  0xb8   :  { %1874 = vmatpush1.bf16.msra.mxu0 %v1873_v62  ;;  %v213_v26 = vld [vmem:[#allocation5 + $0x1e0] sm:$0xff]  ;;  %v2139_v28 = vpack.c.bf16 %v216_v21, %v212_v20  ;;  %v215_v29 = vld [vmem:[#allocation5 + $0x1f0] sm:$0xff]  ;;  %v218_v30 = vld [vmem:[#allocation5 + $0x208] sm:$0xff] }
  0xb9   :  { %2130 = vmatpush1.bf16.msra.mxu1 %v2129_v63  ;;  %1876 = vmatprep.subr.bf16.mxu0 %v1875_v0  ;;  %v222_v31 = vld [vmem:[#allocation5 + $0x228] sm:$0xff]  ;;  %v220_v32 = vld [vmem:[#allocation5 + $0x218] sm:$0xff]  ;;  %v1885_v34 = vpack.c.bf16 %v213_v26, %v209_v25  ;;  %v2141_v35 = vpack.c.bf16 %v215_v29, %v211_v27  ;;  %v217_v37 = vld [vmem:[#allocation5 + $0x200] sm:$0xff] }
  0xba   :  { %2132 = vmatprep.subr.bf16.mxu1 %v2131_v4  ;;  %v224_v33 = vld [vmem:[#allocation5 + $0x238] sm:$0xff]  ;;  %v1887_v36 = vpack.c.bf16 %v222_v31, %v218_v30  ;;  %v221_v38 = vld [vmem:[#allocation5 + $0x220] sm:$0xff]  ;;  %v219_v39 = vld [vmem:[#allocation5 + $0x210] sm:$0xff] }
  0xbb   :  { %v2143_v40 = vpack.c.bf16 %v224_v33, %v220_v32  ;;  %v223_v41 = vld [vmem:[#allocation5 + $0x230] sm:$0xff]  ;;  %v226_v42 = vld [vmem:[#allocation5 + $0x248] sm:$0xff]  ;;  %v228_v44 = vld [vmem:[#allocation5 + $0x258] sm:$0xff]  ;;  %v1889_v46 = vpack.c.bf16 %v221_v38, %v217_v37 }
  0xbc   :  { %1878 = vmatpush1.bf16.msra.mxu0 %v1877_v10  ;;  %v230_v43 = vld [vmem:[#allocation5 + $0x268] sm:$0xff]  ;;  %v232_v45 = vld [vmem:[#allocation5 + $0x278] sm:$0xff]  ;;  %v2145_v47 = vpack.c.bf16 %v223_v41, %v219_v39  ;;  %v225_v49 = vld [vmem:[#allocation5 + $0x240] sm:$0xff] }
  0xbd   :  { %2134 = vmatpush1.bf16.msra.mxu1 %v2133_v11  ;;  %1880 = vmatprep.subr.bf16.mxu0 %v1879_v12  ;;  %v1891_v48 = vpack.c.bf16 %v230_v43, %v226_v42  ;;  %v229_v50 = vld [vmem:[#allocation5 + $0x260] sm:$0xff]  ;;  %v227_v51 = vld [vmem:[#allocation5 + $0x250] sm:$0xff]  ;;  %v2147_v52 = vpack.c.bf16 %v232_v45, %v228_v44  ;;  %v234_v54 = vld [vmem:[#allocation5 + $0x288] sm:$0xff] }
  0xbe   :  { %2136 = vmatprep.subr.bf16.mxu1 %v2135_v16  ;;  %v231_v53 = vld [vmem:[#allocation5 + $0x270] sm:$0xff]  ;;  %v238_v55 = vld [vmem:[#allocation5 + $0x2a8] sm:$0xff]  ;;  %v236_v56 = vld [vmem:[#allocation5 + $0x298] sm:$0xff]  ;;  %v1893_v58 = vpack.c.bf16 %v229_v50, %v225_v49 }
  0xbf   :  { %v240_v57 = vld [vmem:[#allocation5 + $0x2b8] sm:$0xff]  ;;  %v2149_v59 = vpack.c.bf16 %v231_v53, %v227_v51  ;;  %v1895_v60 = vpack.c.bf16 %v238_v55, %v234_v54  ;;  %v233_v61 = vld [vmem:[#allocation5 + $0x280] sm:$0xff]  ;;  %v235_v63 = vld [vmem:[#allocation5 + $0x290] sm:$0xff] }
  0xc0   :  { %1882 = vmatpush1.bf16.msra.mxu0 %v1881_v22  ;;  %v237_v62 = vld [vmem:[#allocation5 + $0x2a0] sm:$0xff]  ;;  %v2151_v0 = vpack.c.bf16 %v240_v57, %v236_v56  ;;  %v239_v1 = vld [vmem:[#allocation5 + $0x2b0] sm:$0xff]  ;;  %v242_v2 = vld [vmem:[#allocation5 + $0x2c8] sm:$0xff] }
  0xc1   :  { %2138 = vmatpush1.bf16.msra.mxu1 %v2137_v23  ;;  %1884 = vmatprep.subr.bf16.mxu0 %v1883_v24  ;;  %v246_v3 = vld [vmem:[#allocation5 + $0x2e8] sm:$0xff]  ;;  %v244_v4 = vld [vmem:[#allocation5 + $0x2d8] sm:$0xff]  ;;  %v1897_v6 = vpack.c.bf16 %v237_v62, %v233_v61  ;;  %v241_v7 = vld [vmem:[#allocation5 + $0x2c0] sm:$0xff]  ;;  %v2153_v8 = vpack.c.bf16 %v239_v1, %v235_v63 }
  0xc2   :  { %2140 = vmatprep.subr.bf16.mxu1 %v2139_v28  ;;  %v248_v5 = vld [vmem:[#allocation5 + $0x2f8] sm:$0xff]  ;;  %v1899_v9 = vpack.c.bf16 %v246_v3, %v242_v2  ;;  %v245_v10 = vld [vmem:[#allocation5 + $0x2e0] sm:$0xff]  ;;  %v243_v11 = vld [vmem:[#allocation5 + $0x2d0] sm:$0xff] }
  0xc3   :  { %v247_v12 = vld [vmem:[#allocation5 + $0x2f0] sm:$0xff]  ;;  %v2155_v13 = vpack.c.bf16 %v248_v5, %v244_v4  ;;  %v250_v14 = vld [vmem:[#allocation5 + $0x308] sm:$0xff]  ;;  %v252_v17 = vld [vmem:[#allocation5 + $0x318] sm:$0xff]  ;;  %v1901_v19 = vpack.c.bf16 %v245_v10, %v241_v7 }
  0xc4   :  { %1886 = vmatpush1.bf16.msra.mxu0 %v1885_v34  ;;  %v254_v15 = vld [vmem:[#allocation5 + $0x328] sm:$0xff]  ;;  %v256_v18 = vld [vmem:[#allocation5 + $0x338] sm:$0xff]  ;;  %v2157_v20 = vpack.c.bf16 %v247_v12, %v243_v11  ;;  %v249_v22 = vld [vmem:[#allocation5 + $0x300] sm:$0xff] }
  0xc5   :  { %2142 = vmatpush1.bf16.msra.mxu1 %v2141_v35  ;;  %1888 = vmatprep.subr.bf16.mxu0 %v1887_v36  ;;  %v146_v16 = vld [vmem:[#allocation2 + $0x8] sm:$0xff]  ;;  %v1903_v21 = vpack.c.bf16 %v254_v15, %v250_v14  ;;  %v253_v23 = vld [vmem:[#allocation5 + $0x320] sm:$0xff]  ;;  %v251_v24 = vld [vmem:[#allocation5 + $0x310] sm:$0xff]  ;;  %v2159_v25 = vpack.c.bf16 %v256_v18, %v252_v17 }
  0xc6   :  { %2144 = vmatprep.subr.bf16.mxu1 %v2143_v40  ;;  %751 = vmatprep.mubr.f32.mxu0 %v146_v16  ;;  %v255_v26 = vld [vmem:[#allocation5 + $0x330] sm:$0xff]  ;;  %v258_v27 = vld [vmem:[#allocation5 + $0x348] sm:$0xff]  ;;  %v260_v29 = vld [vmem:[#allocation5 + $0x358] sm:$0xff]  ;;  %v1905_v31 = vpack.c.bf16 %v253_v23, %v249_v22 }
  0xc7   :  { %1035 = vmatprep.mubr.f32.mxu1 %v146_v16  ;;  %v262_v28 = vld [vmem:[#allocation5 + $0x368] sm:$0xff]  ;;  %v264_v30 = vld [vmem:[#allocation5 + $0x378] sm:$0xff]  ;;  %v2161_v32 = vpack.c.bf16 %v255_v26, %v251_v24  ;;  %v257_v34 = vld [vmem:[#allocation5 + $0x340] sm:$0xff] }
  0xc8   :  { %1890 = vmatpush1.bf16.msra.mxu0 %v1889_v46  ;;  %v1907_v33 = vpack.c.bf16 %v262_v28, %v258_v27  ;;  %v261_v35 = vld [vmem:[#allocation5 + $0x360] sm:$0xff]  ;;  %v259_v36 = vld [vmem:[#allocation5 + $0x350] sm:$0xff]  ;;  %v2163_v37 = vpack.c.bf16 %v264_v30, %v260_v29  ;;  %v266_v39 = vld [vmem:[#allocation5 + $0x388] sm:$0xff] }
  0xc9   :  { %2146 = vmatpush1.bf16.msra.mxu1 %v2145_v47  ;;  %1892 = vmatprep.subr.bf16.mxu0 %v1891_v48  ;;  %v263_v38 = vld [vmem:[#allocation5 + $0x370] sm:$0xff]  ;;  %v270_v40 = vld [vmem:[#allocation5 + $0x3a8] sm:$0xff]  ;;  %v268_v41 = vld [vmem:[#allocation5 + $0x398] sm:$0xff]  ;;  %v1909_v43 = vpack.c.bf16 %v261_v35, %v257_v34 }
  0xca   :  { %2148 = vmatprep.subr.bf16.mxu1 %v2147_v52  ;;  %v272_v42 = vld [vmem:[#allocation5 + $0x3b8] sm:$0xff]  ;;  %v2165_v44 = vpack.c.bf16 %v263_v38, %v259_v36  ;;  %v1911_v45 = vpack.c.bf16 %v270_v40, %v266_v39  ;;  %v265_v46 = vld [vmem:[#allocation5 + $0x380] sm:$0xff]  ;;  %v267_v48 = vld [vmem:[#allocation5 + $0x390] sm:$0xff] }
  0xcb   :  { %v269_v47 = vld [vmem:[#allocation5 + $0x3a0] sm:$0xff]  ;;  %v2167_v49 = vpack.c.bf16 %v272_v42, %v268_v41  ;;  %v271_v50 = vld [vmem:[#allocation5 + $0x3b0] sm:$0xff]  ;;  %v274_v51 = vld [vmem:[#allocation5 + $0x3c8] sm:$0xff] }
  0xcc   :  { %1894 = vmatpush1.bf16.msra.mxu0 %v1893_v58  ;;  %v278_v52 = vld [vmem:[#allocation5 + $0x3e8] sm:$0xff]  ;;  %v276_v53 = vld [vmem:[#allocation5 + $0x3d8] sm:$0xff]  ;;  %v1913_v55 = vpack.c.bf16 %v269_v47, %v265_v46  ;;  %v2169_v56 = vpack.c.bf16 %v271_v50, %v267_v48  ;;  %v273_v58 = vld [vmem:[#allocation5 + $0x3c0] sm:$0xff] }
  0xcd   :  { %2150 = vmatpush1.bf16.msra.mxu1 %v2149_v59  ;;  %1896 = vmatprep.subr.bf16.mxu0 %v1895_v60  ;;  %v280_v54 = vld [vmem:[#allocation5 + $0x3f8] sm:$0xff]  ;;  %v1915_v57 = vpack.c.bf16 %v278_v52, %v274_v51  ;;  %v277_v59 = vld [vmem:[#allocation5 + $0x3e0] sm:$0xff]  ;;  %v275_v60 = vld [vmem:[#allocation5 + $0x3d0] sm:$0xff] }
  0xce   :  { %2152 = vmatprep.subr.bf16.mxu1 %v2151_v0  ;;  %v2171_v61 = vpack.c.bf16 %v280_v54, %v276_v53  ;;  %v279_v62 = vld [vmem:[#allocation5 + $0x3f0] sm:$0xff]  ;;  %v282_v63 = vld [vmem:[#allocation5 + $0x408] sm:$0xff]  ;;  %v284_v1 = vld [vmem:[#allocation5 + $0x418] sm:$0xff]  ;;  %v1917_v3 = vpack.c.bf16 %v277_v59, %v273_v58 }
  0xcf   :  { %v286_v0 = vld [vmem:[#allocation5 + $0x428] sm:$0xff]  ;;  %v288_v2 = vld [vmem:[#allocation5 + $0x438] sm:$0xff]  ;;  %v2173_v4 = vpack.c.bf16 %v279_v62, %v275_v60  ;;  %v285_v7 = vld [vmem:[#allocation5 + $0x420] sm:$0xff] }
  0xd0   :  { %1898 = vmatpush1.bf16.msra.mxu0 %v1897_v6  ;;  %v1919_v5 = vpack.c.bf16 %v286_v0, %v282_v63  ;;  %v281_v6 = vld [vmem:[#allocation5 + $0x400] sm:$0xff]  ;;  %v287_v10 = vld [vmem:[#allocation5 + $0x430] sm:$0xff]  ;;  %v290_v11 = vld [vmem:[#allocation5 + $0x448] sm:$0xff] }
  0xd1   :  { %2154 = vmatpush1.bf16.msra.mxu1 %v2153_v8  ;;  %1900 = vmatprep.subr.bf16.mxu0 %v1899_v9  ;;  %v283_v8 = vld [vmem:[#allocation5 + $0x410] sm:$0xff]  ;;  %v2175_v9 = vpack.c.bf16 %v288_v2, %v284_v1  ;;  %v294_v12 = vld [vmem:[#allocation5 + $0x468] sm:$0xff]  ;;  %v296_v14 = vld [vmem:[#allocation5 + $0x478] sm:$0xff]  ;;  %v1921_v16 = vpack.c.bf16 %v285_v7, %v281_v6 }
  0xd2   :  { %2156 = vmatprep.subr.bf16.mxu1 %v2155_v13  ;;  %v292_v13 = vld [vmem:[#allocation5 + $0x458] sm:$0xff]  ;;  %v145_v15 = vld [vmem:[#allocation2] sm:$0xff]  ;;  %v2177_v17 = vpack.c.bf16 %v287_v10, %v283_v8  ;;  %v1923_v18 = vpack.c.bf16 %v294_v12, %v290_v11  ;;  %v295_v23 = vld [vmem:[#allocation5 + $0x470] sm:$0xff] }
  0xd3   :  { %v2179_v22 = vpack.c.bf16 %v296_v14, %v292_v13  ;;  %v298_v24 = vld [vmem:[#allocation5 + $0x488] sm:$0xff]  ;;  %v300_v26 = vld [vmem:[#allocation5 + $0x498] sm:$0xff]  ;;  %v303_v35 = vld [vmem:[#allocation5 + $0x4b0] sm:$0xff] }
  0xd4   :  { %1902 = vmatpush1.bf16.msra.mxu0 %v1901_v19  ;;  %v289_v19 = vld [vmem:[#allocation5 + $0x440] sm:$0xff]  ;;  %v304_v27 = vld [vmem:[#allocation5 + $0x4b8] sm:$0xff]  ;;  %v306_v36 = vld [vmem:[#allocation5 + $0x4c8] sm:$0xff] }
  0xd5   :  { %2158 = vmatpush1.bf16.msra.mxu1 %v2157_v20  ;;  %1904 = vmatprep.subr.bf16.mxu0 %v1903_v21  ;;  %v293_v20 = vld [vmem:[#allocation5 + $0x460] sm:$0xff]  ;;  %v291_v21 = vld [vmem:[#allocation5 + $0x450] sm:$0xff]  ;;  %v2183_v34 = vpack.c.bf16 %v304_v27, %v300_v26  ;;  %v308_v38 = vld [vmem:[#allocation5 + $0x4d8] sm:$0xff] }
  0xd6   :  { %2160 = vmatprep.subr.bf16.mxu1 %v2159_v25  ;;  %v302_v25 = vld [vmem:[#allocation5 + $0x4a8] sm:$0xff]  ;;  %v1925_v28 = vpack.c.bf16 %v293_v20, %v289_v19  ;;  %v2181_v29 = vpack.c.bf16 %v295_v23, %v291_v21  ;;  %v312_v39 = vld [vmem:[#allocation5 + $0x4f8] sm:$0xff]  ;;  %v311_v47 = vld [vmem:[#allocation5 + $0x4f0] sm:$0xff] }
  0xd7   :  { %v1927_v30 = vpack.c.bf16 %v302_v25, %v298_v24  ;;  %v2187_v46 = vpack.c.bf16 %v312_v39, %v308_v38  ;;  %v314_v48 = vld [vmem:[#allocation5 + $0x508] sm:$0xff]  ;;  %v316_v50 = vld [vmem:[#allocation5 + $0x518] sm:$0xff]  ;;  %v319_v59 = vld [vmem:[#allocation5 + $0x530] sm:$0xff] }
  0xd8   :  { %1906 = vmatpush1.bf16.msra.mxu0 %v1905_v31  ;;  %v297_v31 = vld [vmem:[#allocation5 + $0x480] sm:$0xff]  ;;  %v320_v51 = vld [vmem:[#allocation5 + $0x538] sm:$0xff]  ;;  %v322_v60 = vld [vmem:[#allocation5 + $0x548] sm:$0xff] }
  0xd9   :  { %2162 = vmatpush1.bf16.msra.mxu1 %v2161_v32  ;;  %1908 = vmatprep.subr.bf16.mxu0 %v1907_v33  ;;  %v301_v32 = vld [vmem:[#allocation5 + $0x4a0] sm:$0xff]  ;;  %v299_v33 = vld [vmem:[#allocation5 + $0x490] sm:$0xff]  ;;  %v2191_v58 = vpack.c.bf16 %v320_v51, %v316_v50  ;;  %v324_v62 = vld [vmem:[#allocation5 + $0x558] sm:$0xff] }
  0xda   :  { %2164 = vmatprep.subr.bf16.mxu1 %v2163_v37  ;;  %v310_v37 = vld [vmem:[#allocation5 + $0x4e8] sm:$0xff]  ;;  %v1929_v40 = vpack.c.bf16 %v301_v32, %v297_v31  ;;  %v2185_v41 = vpack.c.bf16 %v303_v35, %v299_v33  ;;  %v328_v63 = vld [vmem:[#allocation5 + $0x578] sm:$0xff]  ;;  %v327_v7 = vld [vmem:[#allocation5 + $0x570] sm:$0xff] }
  0xdb   :  { %v1931_v42 = vpack.c.bf16 %v310_v37, %v306_v36  ;;  %v2195_v6 = vpack.c.bf16 %v328_v63, %v324_v62  ;;  %v330_v8 = vld [vmem:[#allocation5 + $0x588] sm:$0xff]  ;;  %v332_v10 = vld [vmem:[#allocation5 + $0x598] sm:$0xff]  ;;  %v329_v13 = vld [vmem:[#allocation5 + $0x580] sm:$0xff] }
  0xdc   :  { %1910 = vmatpush1.bf16.msra.mxu0 %v1909_v43  ;;  %v305_v43 = vld [vmem:[#allocation5 + $0x4c0] sm:$0xff]  ;;  %v336_v11 = vld [vmem:[#allocation5 + $0x5b8] sm:$0xff]  ;;  %v338_v20 = vld [vmem:[#allocation5 + $0x5c8] sm:$0xff] }
  0xdd   :  { %2166 = vmatpush1.bf16.msra.mxu1 %v2165_v44  ;;  %1912 = vmatprep.subr.bf16.mxu0 %v1911_v45  ;;  %v309_v44 = vld [vmem:[#allocation5 + $0x4e0] sm:$0xff]  ;;  %v307_v45 = vld [vmem:[#allocation5 + $0x4d0] sm:$0xff]  ;;  %v2199_v19 = vpack.c.bf16 %v336_v11, %v332_v10  ;;  %v342_v21 = vld [vmem:[#allocation5 + $0x5e8] sm:$0xff] }
  0xde   :  { %2168 = vmatprep.subr.bf16.mxu1 %v2167_v49  ;;  %v318_v49 = vld [vmem:[#allocation5 + $0x528] sm:$0xff]  ;;  %v1933_v52 = vpack.c.bf16 %v309_v44, %v305_v43  ;;  %v2189_v53 = vpack.c.bf16 %v311_v47, %v307_v45  ;;  %v340_v23 = vld [vmem:[#allocation5 + $0x5d8] sm:$0xff]  ;;  %v1947_v27 = vpack.c.bf16 %v342_v21, %v338_v20  ;;  %v343_v32 = vld [vmem:[#allocation5 + $0x5f0] sm:$0xff] }
  0xdf   :  { %v1935_v54 = vpack.c.bf16 %v318_v49, %v314_v48  ;;  %v344_v24 = vld [vmem:[#allocation5 + $0x5f8] sm:$0xff]  ;;  %v346_v33 = vld [vmem:[#allocation5 + $0x608] sm:$0xff]  ;;  %v351_v44 = vld [vmem:[#allocation5 + $0x630] sm:$0xff] }
  0xe0   :  { %1914 = vmatpush1.bf16.msra.mxu0 %v1913_v55  ;;  %v313_v55 = vld [vmem:[#allocation5 + $0x500] sm:$0xff]  ;;  %v2203_v31 = vpack.c.bf16 %v344_v24, %v340_v23  ;;  %v348_v35 = vld [vmem:[#allocation5 + $0x618] sm:$0xff]  ;;  %v354_v45 = vld [vmem:[#allocation5 + $0x648] sm:$0xff] }
  0xe1   :  { %2170 = vmatpush1.bf16.msra.mxu1 %v2169_v56  ;;  %1916 = vmatprep.subr.bf16.mxu0 %v1915_v57  ;;  %v317_v56 = vld [vmem:[#allocation5 + $0x520] sm:$0xff]  ;;  %v315_v57 = vld [vmem:[#allocation5 + $0x510] sm:$0xff]  ;;  %v352_v36 = vld [vmem:[#allocation5 + $0x638] sm:$0xff] }
  0xe2   :  { %2172 = vmatprep.subr.bf16.mxu1 %v2171_v61  ;;  %v326_v61 = vld [vmem:[#allocation5 + $0x568] sm:$0xff]  ;;  %v1937_v0 = vpack.c.bf16 %v317_v56, %v313_v55  ;;  %v2193_v1 = vpack.c.bf16 %v319_v59, %v315_v57  ;;  %v2207_v43 = vpack.c.bf16 %v352_v36, %v348_v35  ;;  %v356_v47 = vld [vmem:[#allocation5 + $0x658] sm:$0xff]  ;;  %v359_v56 = vld [vmem:[#allocation5 + $0x670] sm:$0xff] }
  0xe3   :  { %v1939_v2 = vpack.c.bf16 %v326_v61, %v322_v60  ;;  %v360_v48 = vld [vmem:[#allocation5 + $0x678] sm:$0xff]  ;;  %v362_v57 = vld [vmem:[#allocation5 + $0x688] sm:$0xff]  ;;  %v377_v24 = vld [vmem:[#allocation5 + $0x700] sm:$0xff] }
  0xe4   :  { %1918 = vmatpush1.bf16.msra.mxu0 %v1917_v3  ;;  %v321_v3 = vld [vmem:[#allocation5 + $0x540] sm:$0xff]  ;;  %v2211_v55 = vpack.c.bf16 %v360_v48, %v356_v47  ;;  %v364_v59 = vld [vmem:[#allocation5 + $0x698] sm:$0xff] }
  0xe5   :  { %2174 = vmatpush1.bf16.msra.mxu1 %v2173_v4  ;;  %1920 = vmatprep.subr.bf16.mxu0 %v1919_v5  ;;  %v325_v4 = vld [vmem:[#allocation5 + $0x560] sm:$0xff]  ;;  %v323_v5 = vld [vmem:[#allocation5 + $0x550] sm:$0xff]  ;;  %v368_v60 = vld [vmem:[#allocation5 + $0x6b8] sm:$0xff] }
  0xe6   :  { %2176 = vmatprep.subr.bf16.mxu1 %v2175_v9  ;;  %v334_v9 = vld [vmem:[#allocation5 + $0x5a8] sm:$0xff]  ;;  %v1941_v12 = vpack.c.bf16 %v325_v4, %v321_v3  ;;  %v2197_v14 = vpack.c.bf16 %v327_v7, %v323_v5  ;;  %v2215_v3 = vpack.c.bf16 %v368_v60, %v364_v59  ;;  %v367_v4 = vld [vmem:[#allocation5 + $0x6b0] sm:$0xff]  ;;  %v372_v7 = vld [vmem:[#allocation5 + $0x6d8] sm:$0xff] }
  0xe7   :  { %752 = vmatmul.mubr.f32.vlgmr.msra.gmra.mrb[0].mxu0 %v145_v15  ;;  %v370_v5 = vld [vmem:[#allocation5 + $0x6c8] sm:$0xff]  ;;  %v384_v20 = vld [vmem:[#allocation5 + $0x738] sm:$0xff]  ;;  %v385_v36 = vld [vmem:[#allocation5 + $0x740] sm:$0xff] }
  0xe8   :  { %1922 = vmatpush1.bf16.msra.mxu0 %v1921_v16  ;;  %1036 = vmatmul.mubr.f32.vlgmr.msra.gmra.mrb[0].mxu1 %v145_v15  ;;  %v1943_v15 = vpack.c.bf16 %v334_v9, %v330_v8  ;;  %v333_v16 = vld [vmem:[#allocation5 + $0x5a0] sm:$0xff]  ;;  %v376_v8 = vld [vmem:[#allocation5 + $0x6f8] sm:$0xff] }
  0xe9   :  { %2178 = vmatpush1.bf16.msra.mxu1 %v2177_v17  ;;  %1924 = vmatprep.subr.bf16.mxu0 %v1923_v18  ;;  %v331_v17 = vld [vmem:[#allocation5 + $0x590] sm:$0xff]  ;;  %v1945_v25 = vpack.c.bf16 %v333_v16, %v329_v13  ;;  %v373_v13 = vld [vmem:[#allocation5 + $0x6e0] sm:$0xff] }
  0xea   :  { %2180 = vmatprep.subr.bf16.mxu1 %v2179_v22  ;;  %v335_v18 = vld [vmem:[#allocation5 + $0x5b0] sm:$0xff]  ;;  %v148_v22 = vld [vmem:[#allocation2 + $0x18] sm:$0xff]  ;;  %v393_v48 = vld [vmem:[#allocation5 + $0x780] sm:$0xff] }
  0xeb   :  { %822 = vmatprep.mubr.f32.mxu0 %v148_v22  ;;  %1106 = vmatprep.mubr.f32.mxu1 %v148_v22  ;;  %v2201_v26 = vpack.c.bf16 %v335_v18, %v331_v17  ;;  %v375_v16 = vld [vmem:[#allocation5 + $0x6f0] sm:$0xff]  ;;  %v378_v17 = vld [vmem:[#allocation5 + $0x708] sm:$0xff]  ;;  %v401_v60 = vld [vmem:[#allocation5 + $0x7c0] sm:$0xff] }
  0xec   :  { %1926 = vmatpush1.bf16.msra.mxu0 %v1925_v28  ;;  %v337_v28 = vld [vmem:[#allocation5 + $0x5c0] sm:$0xff]  ;;  %v382_v18 = vld [vmem:[#allocation5 + $0x728] sm:$0xff] }
  0xed   :  { %2182 = vmatpush1.bf16.msra.mxu1 %v2181_v29  ;;  %1928 = vmatprep.subr.bf16.mxu0 %v1927_v30  ;;  %v341_v29 = vld [vmem:[#allocation5 + $0x5e0] sm:$0xff]  ;;  %v339_v30 = vld [vmem:[#allocation5 + $0x5d0] sm:$0xff]  ;;  %v1967_v23 = vpack.c.bf16 %v382_v18, %v378_v17 }
  0xee   :  { %2184 = vmatprep.subr.bf16.mxu1 %v2183_v34  ;;  %v350_v34 = vld [vmem:[#allocation5 + $0x628] sm:$0xff]  ;;  %v1949_v37 = vpack.c.bf16 %v341_v29, %v337_v28  ;;  %v2205_v38 = vpack.c.bf16 %v343_v32, %v339_v30  ;;  %v383_v28 = vld [vmem:[#allocation5 + $0x730] sm:$0xff]  ;;  %v392_v32 = vld [vmem:[#allocation5 + $0x778] sm:$0xff] }
  0xef   :  { %v1951_v39 = vpack.c.bf16 %v350_v34, %v346_v33  ;;  %v386_v29 = vld [vmem:[#allocation5 + $0x748] sm:$0xff]  ;;  %v147_v17 = vld [vmem:[#allocation2 + $0x10] sm:$0xff] }
  0xf0   :  { %1930 = vmatpush1.bf16.msra.mxu0 %v1929_v40  ;;  %v345_v40 = vld [vmem:[#allocation5 + $0x600] sm:$0xff]  ;;  %v390_v30 = vld [vmem:[#allocation5 + $0x768] sm:$0xff] }
  0xf1   :  { %2186 = vmatpush1.bf16.msra.mxu1 %v2185_v41  ;;  %1932 = vmatprep.subr.bf16.mxu0 %v1931_v42  ;;  %v349_v41 = vld [vmem:[#allocation5 + $0x620] sm:$0xff]  ;;  %v347_v42 = vld [vmem:[#allocation5 + $0x610] sm:$0xff]  ;;  %v1971_v35 = vpack.c.bf16 %v390_v30, %v386_v29  ;;  %v432_v29 = vld [vmem:[#allocation5 + $0x8b8] sm:$0xff] }
  0xf2   :  { %2188 = vmatprep.subr.bf16.mxu1 %v2187_v46  ;;  %v358_v46 = vld [vmem:[#allocation5 + $0x668] sm:$0xff]  ;;  %v1953_v49 = vpack.c.bf16 %v349_v41, %v345_v40  ;;  %v2209_v50 = vpack.c.bf16 %v351_v44, %v347_v42  ;;  %v391_v40 = vld [vmem:[#allocation5 + $0x770] sm:$0xff]  ;;  %v400_v44 = vld [vmem:[#allocation5 + $0x7b8] sm:$0xff] }
  0xf3   :  { %v1955_v51 = vpack.c.bf16 %v358_v46, %v354_v45  ;;  %v394_v41 = vld [vmem:[#allocation5 + $0x788] sm:$0xff] }
  0xf4   :  { %1934 = vmatpush1.bf16.msra.mxu0 %v1933_v52  ;;  %v353_v52 = vld [vmem:[#allocation5 + $0x640] sm:$0xff]  ;;  %v398_v42 = vld [vmem:[#allocation5 + $0x7a8] sm:$0xff] }
  0xf5   :  { %2190 = vmatpush1.bf16.msra.mxu1 %v2189_v53  ;;  %1936 = vmatprep.subr.bf16.mxu0 %v1935_v54  ;;  %v357_v53 = vld [vmem:[#allocation5 + $0x660] sm:$0xff]  ;;  %v355_v54 = vld [vmem:[#allocation5 + $0x650] sm:$0xff]  ;;  %v1975_v47 = vpack.c.bf16 %v398_v42, %v394_v41  ;;  %v150_v30 = vld [vmem:[#allocation2 + $0x28] sm:$0xff] }
  0xf6   :  { %2192 = vmatprep.subr.bf16.mxu1 %v2191_v58  ;;  %v366_v58 = vld [vmem:[#allocation5 + $0x6a8] sm:$0xff]  ;;  %v1957_v61 = vpack.c.bf16 %v357_v53, %v353_v52  ;;  %v2213_v62 = vpack.c.bf16 %v359_v56, %v355_v54  ;;  %v399_v52 = vld [vmem:[#allocation5 + $0x7b0] sm:$0xff]  ;;  %v408_v56 = vld [vmem:[#allocation5 + $0x7f8] sm:$0xff] }
  0xf7   :  { %v1959_v63 = vpack.c.bf16 %v366_v58, %v362_v57  ;;  %v402_v53 = vld [vmem:[#allocation5 + $0x7c8] sm:$0xff]  ;;  %v436_v41 = vld [vmem:[#allocation5 + $0x8d8] sm:$0xff] }
  0xf8   :  { %1938 = vmatpush1.bf16.msra.mxu0 %v1937_v0  ;;  %v361_v0 = vld [vmem:[#allocation5 + $0x680] sm:$0xff]  ;;  %v406_v54 = vld [vmem:[#allocation5 + $0x7e8] sm:$0xff]  ;;  %v440_v42 = vld [vmem:[#allocation5 + $0x8f8] sm:$0xff] }
  0xf9   :  { %2194 = vmatpush1.bf16.msra.mxu1 %v2193_v1  ;;  %1940 = vmatprep.subr.bf16.mxu0 %v1939_v2  ;;  %v365_v1 = vld [vmem:[#allocation5 + $0x6a0] sm:$0xff]  ;;  %v363_v2 = vld [vmem:[#allocation5 + $0x690] sm:$0xff]  ;;  %v1979_v59 = vpack.c.bf16 %v406_v54, %v402_v53  ;;  %v444_v53 = vld [vmem:[#allocation5 + $0x918] sm:$0xff] }
  0xfa   :  { %2196 = vmatprep.subr.bf16.mxu1 %v2195_v6  ;;  %v374_v6 = vld [vmem:[#allocation5 + $0x6e8] sm:$0xff]  ;;  %v1961_v9 = vpack.c.bf16 %v365_v1, %v361_v0  ;;  %v2217_v10 = vpack.c.bf16 %v367_v4, %v363_v2  ;;  %v407_v0 = vld [vmem:[#allocation5 + $0x7f0] sm:$0xff]  ;;  %v416_v4 = vld [vmem:[#allocation5 + $0x838] sm:$0xff] }
  0xfb   :  { %v1963_v11 = vpack.c.bf16 %v374_v6, %v370_v5  ;;  %v410_v1 = vld [vmem:[#allocation5 + $0x808] sm:$0xff]  ;;  %v448_v54 = vld [vmem:[#allocation5 + $0x938] sm:$0xff] }
  0xfc   :  { %1942 = vmatpush1.bf16.msra.mxu0 %v1941_v12  ;;  %v369_v12 = vld [vmem:[#allocation5 + $0x6c0] sm:$0xff]  ;;  %v414_v2 = vld [vmem:[#allocation5 + $0x828] sm:$0xff] }
  0xfd   :  { %2198 = vmatpush1.bf16.msra.mxu1 %v2197_v14  ;;  %1944 = vmatprep.subr.bf16.mxu0 %v1943_v15  ;;  %v371_v14 = vld [vmem:[#allocation5 + $0x6d0] sm:$0xff]  ;;  %v2219_v15 = vpack.c.bf16 %v376_v8, %v372_v7  ;;  %v1965_v21 = vpack.c.bf16 %v373_v13, %v369_v12  ;;  %v1983_v7 = vpack.c.bf16 %v414_v2, %v410_v1  ;;  %v409_v8 = vld [vmem:[#allocation5 + $0x800] sm:$0xff]  ;;  %v418_v13 = vld [vmem:[#allocation5 + $0x848] sm:$0xff] }
  0xfe   :  { %2200 = vmatprep.subr.bf16.mxu1 %v2199_v19  ;;  %v380_v19 = vld [vmem:[#allocation5 + $0x718] sm:$0xff]  ;;  %v2221_v22 = vpack.c.bf16 %v375_v16, %v371_v14  ;;  %v415_v12 = vld [vmem:[#allocation5 + $0x830] sm:$0xff]  ;;  %v422_v14 = vld [vmem:[#allocation5 + $0x868] sm:$0xff] }
  0xff   :  { %v424_v16 = vld [vmem:[#allocation5 + $0x878] sm:$0xff] }
 0x100   :  { %1946 = vmatpush1.bf16.msra.mxu0 %v1945_v25  ;;  %v381_v25 = vld [vmem:[#allocation5 + $0x720] sm:$0xff]  ;;  %v452_v1 = vld [vmem:[#allocation5 + $0x958] sm:$0xff] }
 0x101   :  { %2202 = vmatpush1.bf16.msra.mxu1 %v2201_v26  ;;  %1948 = vmatprep.subr.bf16.mxu0 %v1947_v27  ;;  %v379_v26 = vld [vmem:[#allocation5 + $0x710] sm:$0xff]  ;;  %v2223_v27 = vpack.c.bf16 %v384_v20, %v380_v19  ;;  %v1969_v33 = vpack.c.bf16 %v381_v25, %v377_v24  ;;  %v1987_v20 = vpack.c.bf16 %v422_v14, %v418_v13  ;;  %v456_v2 = vld [vmem:[#allocation5 + $0x978] sm:$0xff] }
 0x102   :  { %2204 = vmatprep.subr.bf16.mxu1 %v2203_v31  ;;  %v388_v31 = vld [vmem:[#allocation5 + $0x758] sm:$0xff]  ;;  %v2225_v34 = vpack.c.bf16 %v383_v28, %v379_v26  ;;  %v423_v25 = vld [vmem:[#allocation5 + $0x870] sm:$0xff]  ;;  %v426_v26 = vld [vmem:[#allocation5 + $0x888] sm:$0xff] }
 0x103   :  { %v428_v28 = vld [vmem:[#allocation5 + $0x898] sm:$0xff] }
 0x104   :  { %1950 = vmatpush1.bf16.msra.mxu0 %v1949_v37  ;;  %v389_v37 = vld [vmem:[#allocation5 + $0x760] sm:$0xff]  ;;  %v460_v13 = vld [vmem:[#allocation5 + $0x998] sm:$0xff] }
 0x105   :  { %2206 = vmatpush1.bf16.msra.mxu1 %v2205_v38  ;;  %1952 = vmatprep.subr.bf16.mxu0 %v1951_v39  ;;  %v387_v38 = vld [vmem:[#allocation5 + $0x750] sm:$0xff]  ;;  %v2227_v39 = vpack.c.bf16 %v392_v32, %v388_v31  ;;  %v1973_v45 = vpack.c.bf16 %v389_v37, %v385_v36  ;;  %v2247_v37 = vpack.c.bf16 %v432_v29, %v428_v28  ;;  %v464_v14 = vld [vmem:[#allocation5 + $0x9b8] sm:$0xff] }
 0x106   :  { %2208 = vmatprep.subr.bf16.mxu1 %v2207_v43  ;;  %v396_v43 = vld [vmem:[#allocation5 + $0x798] sm:$0xff]  ;;  %v2229_v46 = vpack.c.bf16 %v391_v40, %v387_v38  ;;  %v427_v36 = vld [vmem:[#allocation5 + $0x890] sm:$0xff]  ;;  %v438_v40 = vld [vmem:[#allocation5 + $0x8e8] sm:$0xff] }
 0x107   :  { %v431_v38 = vld [vmem:[#allocation5 + $0x8b0] sm:$0xff] }
 0x108   :  { %1954 = vmatpush1.bf16.msra.mxu0 %v1953_v49  ;;  %v397_v49 = vld [vmem:[#allocation5 + $0x7a0] sm:$0xff] }
 0x109   :  { %2210 = vmatpush1.bf16.msra.mxu1 %v2209_v50  ;;  %1956 = vmatprep.subr.bf16.mxu0 %v1955_v51  ;;  %v395_v50 = vld [vmem:[#allocation5 + $0x790] sm:$0xff]  ;;  %v2231_v51 = vpack.c.bf16 %v400_v44, %v396_v43  ;;  %v1977_v57 = vpack.c.bf16 %v397_v49, %v393_v48  ;;  %v2249_v44 = vpack.c.bf16 %v431_v38, %v427_v36  ;;  %v478_v36 = vld [vmem:[#allocation5 + $0xa28] sm:$0xff]  ;;  %v480_v38 = vld [vmem:[#allocation5 + $0xa38] sm:$0xff] }
 0x10a   :  { %2212 = vmatprep.subr.bf16.mxu1 %v2211_v55  ;;  %v404_v55 = vld [vmem:[#allocation5 + $0x7d8] sm:$0xff]  ;;  %v2233_v58 = vpack.c.bf16 %v399_v52, %v395_v50  ;;  %v435_v48 = vld [vmem:[#allocation5 + $0x8d0] sm:$0xff]  ;;  %v2251_v49 = vpack.c.bf16 %v440_v42, %v436_v41  ;;  %v446_v52 = vld [vmem:[#allocation5 + $0x928] sm:$0xff] }
 0x10b   :  { %v439_v50 = vld [vmem:[#allocation5 + $0x8f0] sm:$0xff]  ;;  %v473_v42 = vld [vmem:[#allocation5 + $0xa00] sm:$0xff] }
 0x10c   :  { %1958 = vmatpush1.bf16.msra.mxu0 %v1957_v61  ;;  %v405_v61 = vld [vmem:[#allocation5 + $0x7e0] sm:$0xff] }
 0x10d   :  { %2214 = vmatpush1.bf16.msra.mxu1 %v2213_v62  ;;  %1960 = vmatprep.subr.bf16.mxu0 %v1959_v63  ;;  %v403_v62 = vld [vmem:[#allocation5 + $0x7d0] sm:$0xff]  ;;  %v2235_v63 = vpack.c.bf16 %v408_v56, %v404_v55  ;;  %v1981_v5 = vpack.c.bf16 %v405_v61, %v401_v60  ;;  %v2253_v56 = vpack.c.bf16 %v439_v50, %v435_v48  ;;  %v486_v48 = vld [vmem:[#allocation5 + $0xa68] sm:$0xff]  ;;  %v488_v50 = vld [vmem:[#allocation5 + $0xa78] sm:$0xff] }
 0x10e   :  { %2216 = vmatprep.subr.bf16.mxu1 %v2215_v3  ;;  %v412_v3 = vld [vmem:[#allocation5 + $0x818] sm:$0xff]  ;;  %v2237_v6 = vpack.c.bf16 %v407_v0, %v403_v62  ;;  %v443_v60 = vld [vmem:[#allocation5 + $0x910] sm:$0xff]  ;;  %v2255_v61 = vpack.c.bf16 %v448_v54, %v444_v53  ;;  %v454_v0 = vld [vmem:[#allocation5 + $0x968] sm:$0xff] }
 0x10f   :  { %v447_v62 = vld [vmem:[#allocation5 + $0x930] sm:$0xff]  ;;  %v481_v54 = vld [vmem:[#allocation5 + $0xa40] sm:$0xff] }
 0x110   :  { %1962 = vmatpush1.bf16.msra.mxu0 %v1961_v9  ;;  %v413_v9 = vld [vmem:[#allocation5 + $0x820] sm:$0xff] }
 0x111   :  { %2218 = vmatpush1.bf16.msra.mxu1 %v2217_v10  ;;  %1964 = vmatprep.subr.bf16.mxu0 %v1963_v11  ;;  %v411_v10 = vld [vmem:[#allocation5 + $0x810] sm:$0xff]  ;;  %v2239_v11 = vpack.c.bf16 %v416_v4, %v412_v3  ;;  %v1985_v18 = vpack.c.bf16 %v413_v9, %v409_v8  ;;  %v2257_v4 = vpack.c.bf16 %v447_v62, %v443_v60  ;;  %v494_v60 = vld [vmem:[#allocation5 + $0xaa8] sm:$0xff]  ;;  %v496_v62 = vld [vmem:[#allocation5 + $0xab8] sm:$0xff] }
 0x112   :  { %2220 = vmatprep.subr.bf16.mxu1 %v2219_v15  ;;  %v420_v15 = vld [vmem:[#allocation5 + $0x858] sm:$0xff]  ;;  %v2241_v19 = vpack.c.bf16 %v415_v12, %v411_v10  ;;  %v451_v8 = vld [vmem:[#allocation5 + $0x950] sm:$0xff]  ;;  %v2259_v9 = vpack.c.bf16 %v456_v2, %v452_v1  ;;  %v462_v12 = vld [vmem:[#allocation5 + $0x9a8] sm:$0xff] }
 0x113   :  { %v2243_v24 = vpack.c.bf16 %v424_v16, %v420_v15  ;;  %v455_v10 = vld [vmem:[#allocation5 + $0x970] sm:$0xff]  ;;  %v489_v2 = vld [vmem:[#allocation5 + $0xa80] sm:$0xff] }
 0x114   :  { %1966 = vmatpush1.bf16.msra.mxu0 %v1965_v21  ;;  %v417_v21 = vld [vmem:[#allocation5 + $0x840] sm:$0xff]  ;;  %v2261_v16 = vpack.c.bf16 %v455_v10, %v451_v8  ;;  %v502_v8 = vld [vmem:[#allocation5 + $0xae8] sm:$0xff]  ;;  %v504_v10 = vld [vmem:[#allocation5 + $0xaf8] sm:$0xff] }
 0x115   :  { %2222 = vmatpush1.bf16.msra.mxu1 %v2221_v22  ;;  %1968 = vmatprep.subr.bf16.mxu0 %v1967_v23  ;;  %v421_v22 = vld [vmem:[#allocation5 + $0x860] sm:$0xff]  ;;  %v419_v23 = vld [vmem:[#allocation5 + $0x850] sm:$0xff] }
 0x116   :  { %2224 = vmatprep.subr.bf16.mxu1 %v2223_v27  ;;  %v430_v27 = vld [vmem:[#allocation5 + $0x8a8] sm:$0xff]  ;;  %v1989_v31 = vpack.c.bf16 %v421_v22, %v417_v21  ;;  %v2245_v32 = vpack.c.bf16 %v423_v25, %v419_v23  ;;  %v2263_v21 = vpack.c.bf16 %v464_v14, %v460_v13  ;;  %v463_v22 = vld [vmem:[#allocation5 + $0x9b0] sm:$0xff]  ;;  %v468_v25 = vld [vmem:[#allocation5 + $0x9d8] sm:$0xff] }
 0x117   :  { %v466_v23 = vld [vmem:[#allocation5 + $0x9c8] sm:$0xff]  ;;  %v497_v14 = vld [vmem:[#allocation5 + $0xac0] sm:$0xff] }
 0x118   :  { %1970 = vmatpush1.bf16.msra.mxu0 %v1969_v33  ;;  %v1991_v33 = vpack.c.bf16 %v430_v27, %v426_v26  ;;  %v472_v26 = vld [vmem:[#allocation5 + $0x9f8] sm:$0xff] }
 0x119   :  { %2226 = vmatpush1.bf16.msra.mxu1 %v2225_v34  ;;  %1972 = vmatprep.subr.bf16.mxu0 %v1971_v35  ;;  %v425_v34 = vld [vmem:[#allocation5 + $0x880] sm:$0xff] }
 0x11a   :  { %2228 = vmatprep.subr.bf16.mxu1 %v2227_v39  ;;  %v429_v35 = vld [vmem:[#allocation5 + $0x8a0] sm:$0xff]  ;;  %v434_v39 = vld [vmem:[#allocation5 + $0x8c8] sm:$0xff] }
 0x11b   :  { %v1993_v43 = vpack.c.bf16 %v429_v35, %v425_v34  ;;  %v471_v34 = vld [vmem:[#allocation5 + $0x9f0] sm:$0xff]  ;;  %v474_v35 = vld [vmem:[#allocation5 + $0xa08] sm:$0xff] }
 0x11c   :  { %1974 = vmatpush1.bf16.msra.mxu0 %v1973_v45  ;;  %v1995_v45 = vpack.c.bf16 %v438_v40, %v434_v39  ;;  %v2015_v41 = vpack.c.bf16 %v478_v36, %v474_v35 }
 0x11d   :  { %2230 = vmatpush1.bf16.msra.mxu1 %v2229_v46  ;;  %1976 = vmatprep.subr.bf16.mxu0 %v1975_v47  ;;  %v433_v46 = vld [vmem:[#allocation5 + $0x8c0] sm:$0xff] }
 0x11e   :  { %2232 = vmatprep.subr.bf16.mxu1 %v2231_v51  ;;  %v437_v47 = vld [vmem:[#allocation5 + $0x8e0] sm:$0xff]  ;;  %v442_v51 = vld [vmem:[#allocation5 + $0x908] sm:$0xff] }
 0x11f   :  { %v1997_v55 = vpack.c.bf16 %v437_v47, %v433_v46  ;;  %v479_v46 = vld [vmem:[#allocation5 + $0xa30] sm:$0xff]  ;;  %v482_v47 = vld [vmem:[#allocation5 + $0xa48] sm:$0xff] }
 0x120   :  { %1978 = vmatpush1.bf16.msra.mxu0 %v1977_v57  ;;  %v1999_v57 = vpack.c.bf16 %v446_v52, %v442_v51  ;;  %v2019_v53 = vpack.c.bf16 %v486_v48, %v482_v47 }
 0x121   :  { %2234 = vmatpush1.bf16.msra.mxu1 %v2233_v58  ;;  %1980 = vmatprep.subr.bf16.mxu0 %v1979_v59  ;;  %v441_v58 = vld [vmem:[#allocation5 + $0x900] sm:$0xff] }
 0x122   :  { %2236 = vmatprep.subr.bf16.mxu1 %v2235_v63  ;;  %v445_v59 = vld [vmem:[#allocation5 + $0x920] sm:$0xff]  ;;  %v450_v63 = vld [vmem:[#allocation5 + $0x948] sm:$0xff] }
 0x123   :  { %v2001_v3 = vpack.c.bf16 %v445_v59, %v441_v58  ;;  %v487_v58 = vld [vmem:[#allocation5 + $0xa70] sm:$0xff]  ;;  %v490_v59 = vld [vmem:[#allocation5 + $0xa88] sm:$0xff] }
 0x124   :  { %1982 = vmatpush1.bf16.msra.mxu0 %v1981_v5  ;;  %v2003_v5 = vpack.c.bf16 %v454_v0, %v450_v63  ;;  %v2023_v1 = vpack.c.bf16 %v494_v60, %v490_v59 }
 0x125   :  { %2238 = vmatpush1.bf16.msra.mxu1 %v2237_v6  ;;  %1984 = vmatprep.subr.bf16.mxu0 %v1983_v7  ;;  %v449_v6 = vld [vmem:[#allocation5 + $0x940] sm:$0xff] }
 0x126   :  { %2240 = vmatprep.subr.bf16.mxu1 %v2239_v11  ;;  %v453_v7 = vld [vmem:[#allocation5 + $0x960] sm:$0xff]  ;;  %v458_v11 = vld [vmem:[#allocation5 + $0x988] sm:$0xff] }
 0x127   :  { %823 = vmatmul.mubr.f32.vlgmr.msra.gmra.mrb[0].mxu0 %v147_v17  ;;  %v2005_v15 = vpack.c.bf16 %v453_v7, %v449_v6  ;;  %v495_v6 = vld [vmem:[#allocation5 + $0xab0] sm:$0xff]  ;;  %v498_v7 = vld [vmem:[#allocation5 + $0xac8] sm:$0xff] }
 0x128   :  { %1986 = vmatpush1.bf16.msra.mxu0 %v1985_v18  ;;  %1107 = vmatmul.mubr.f32.vlgmr.msra.gmra.mrb[0].mxu1 %v147_v17  ;;  %v2007_v17 = vpack.c.bf16 %v462_v12, %v458_v11  ;;  %v457_v18 = vld [vmem:[#allocation5 + $0x980] sm:$0xff]  ;;  %v2027_v13 = vpack.c.bf16 %v502_v8, %v498_v7 }
 0x129   :  { %2242 = vmatpush1.bf16.msra.mxu1 %v2241_v19  ;;  %1988 = vmatprep.subr.bf16.mxu0 %v1987_v20  ;;  %v461_v19 = vld [vmem:[#allocation5 + $0x9a0] sm:$0xff]  ;;  %v459_v20 = vld [vmem:[#allocation5 + $0x990] sm:$0xff] }
 0x12a   :  { %2244 = vmatprep.subr.bf16.mxu1 %v2243_v24  ;;  %893 = vmatprep.mubr.f32.mxu0 %v150_v30  ;;  %v470_v24 = vld [vmem:[#allocation5 + $0x9e8] sm:$0xff]  ;;  %v2009_v27 = vpack.c.bf16 %v461_v19, %v457_v18  ;;  %v2265_v28 = vpack.c.bf16 %v463_v22, %v459_v20  ;;  %v503_v18 = vld [vmem:[#allocation5 + $0xaf0] sm:$0xff]  ;;  %v512_v22 = vld [vmem:[#allocation5 + $0xb38] sm:$0xff] }
 0x12b   :  { %1177 = vmatprep.mubr.f32.mxu1 %v150_v30  ;;  %v2011_v29 = vpack.c.bf16 %v470_v24, %v466_v23  ;;  %v465_v30 = vld [vmem:[#allocation5 + $0x9c0] sm:$0xff]  ;;  %v506_v19 = vld [vmem:[#allocation5 + $0xb08] sm:$0xff] }
 0x12c   :  { %1990 = vmatpush1.bf16.msra.mxu0 %v1989_v31  ;;  %v469_v31 = vld [vmem:[#allocation5 + $0x9e0] sm:$0xff]  ;;  %v510_v20 = vld [vmem:[#allocation5 + $0xb28] sm:$0xff] }
 0x12d   :  { %2246 = vmatpush1.bf16.msra.mxu1 %v2245_v32  ;;  %1992 = vmatprep.subr.bf16.mxu0 %v1991_v33  ;;  %v467_v32 = vld [vmem:[#allocation5 + $0x9d0] sm:$0xff]  ;;  %v2267_v33 = vpack.c.bf16 %v472_v26, %v468_v25  ;;  %v2013_v39 = vpack.c.bf16 %v469_v31, %v465_v30  ;;  %v2031_v25 = vpack.c.bf16 %v510_v20, %v506_v19  ;;  %v505_v26 = vld [vmem:[#allocation5 + $0xb00] sm:$0xff]  ;;  %v514_v31 = vld [vmem:[#allocation5 + $0xb48] sm:$0xff] }
 0x12e   :  { %2248 = vmatprep.subr.bf16.mxu1 %v2247_v37  ;;  %v476_v37 = vld [vmem:[#allocation5 + $0xa18] sm:$0xff]  ;;  %v2269_v40 = vpack.c.bf16 %v471_v34, %v467_v32  ;;  %v511_v30 = vld [vmem:[#allocation5 + $0xb30] sm:$0xff]  ;;  %v518_v32 = vld [vmem:[#allocation5 + $0xb68] sm:$0xff] }
 0x12f   :  { %v520_v34 = vld [vmem:[#allocation5 + $0xb78] sm:$0xff]  ;;  %v149_v19 = vld [vmem:[#allocation2 + $0x20] sm:$0xff] }
 0x130   :  { %1994 = vmatpush1.bf16.msra.mxu0 %v1993_v43  ;;  %v477_v43 = vld [vmem:[#allocation5 + $0xa20] sm:$0xff] }
 0x131   :  { %2250 = vmatpush1.bf16.msra.mxu1 %v2249_v44  ;;  %1996 = vmatprep.subr.bf16.mxu0 %v1995_v45  ;;  %v475_v44 = vld [vmem:[#allocation5 + $0xa10] sm:$0xff]  ;;  %v2271_v45 = vpack.c.bf16 %v480_v38, %v476_v37  ;;  %v2017_v51 = vpack.c.bf16 %v477_v43, %v473_v42  ;;  %v2035_v37 = vpack.c.bf16 %v518_v32, %v514_v31  ;;  %v513_v38 = vld [vmem:[#allocation5 + $0xb40] sm:$0xff]  ;;  %v522_v43 = vld [vmem:[#allocation5 + $0xb88] sm:$0xff] }
 0x132   :  { %2252 = vmatprep.subr.bf16.mxu1 %v2251_v49  ;;  %v484_v49 = vld [vmem:[#allocation5 + $0xa58] sm:$0xff]  ;;  %v2273_v52 = vpack.c.bf16 %v479_v46, %v475_v44  ;;  %v519_v42 = vld [vmem:[#allocation5 + $0xb70] sm:$0xff]  ;;  %v526_v44 = vld [vmem:[#allocation5 + $0xba8] sm:$0xff] }
 0x133   :  { %v528_v46 = vld [vmem:[#allocation5 + $0xbb8] sm:$0xff] }
 0x134   :  { %1998 = vmatpush1.bf16.msra.mxu0 %v1997_v55  ;;  %v485_v55 = vld [vmem:[#allocation5 + $0xa60] sm:$0xff]  ;;  %v560_v31 = vld [vmem:[#allocation5 + $0xcb8] sm:$0xff] }
 0x135   :  { %2254 = vmatpush1.bf16.msra.mxu1 %v2253_v56  ;;  %2000 = vmatprep.subr.bf16.mxu0 %v1999_v57  ;;  %v483_v56 = vld [vmem:[#allocation5 + $0xa50] sm:$0xff]  ;;  %v2275_v57 = vpack.c.bf16 %v488_v50, %v484_v49  ;;  %v2021_v63 = vpack.c.bf16 %v485_v55, %v481_v54  ;;  %v2039_v49 = vpack.c.bf16 %v526_v44, %v522_v43  ;;  %v521_v50 = vld [vmem:[#allocation5 + $0xb80] sm:$0xff]  ;;  %v530_v55 = vld [vmem:[#allocation5 + $0xbc8] sm:$0xff] }
 0x136   :  { %2256 = vmatprep.subr.bf16.mxu1 %v2255_v61  ;;  %v492_v61 = vld [vmem:[#allocation5 + $0xa98] sm:$0xff]  ;;  %v2277_v0 = vpack.c.bf16 %v487_v58, %v483_v56  ;;  %v527_v54 = vld [vmem:[#allocation5 + $0xbb0] sm:$0xff]  ;;  %v534_v56 = vld [vmem:[#allocation5 + $0xbe8] sm:$0xff] }
 0x137   :  { %v536_v58 = vld [vmem:[#allocation5 + $0xbf8] sm:$0xff] }
 0x138   :  { %2002 = vmatpush1.bf16.msra.mxu0 %v2001_v3  ;;  %v493_v3 = vld [vmem:[#allocation5 + $0xaa0] sm:$0xff]  ;;  %v152_v32 = vld [vmem:[#allocation2 + $0x38] sm:$0xff] }
 0x139   :  { %2258 = vmatpush1.bf16.msra.mxu1 %v2257_v4  ;;  %2004 = vmatprep.subr.bf16.mxu0 %v2003_v5  ;;  %v491_v4 = vld [vmem:[#allocation5 + $0xa90] sm:$0xff]  ;;  %v2279_v5 = vpack.c.bf16 %v496_v62, %v492_v61  ;;  %v2025_v11 = vpack.c.bf16 %v493_v3, %v489_v2  ;;  %v2043_v61 = vpack.c.bf16 %v534_v56, %v530_v55  ;;  %v529_v62 = vld [vmem:[#allocation5 + $0xbc0] sm:$0xff]  ;;  %v538_v3 = vld [vmem:[#allocation5 + $0xc08] sm:$0xff] }
 0x13a   :  { %2260 = vmatprep.subr.bf16.mxu1 %v2259_v9  ;;  %v500_v9 = vld [vmem:[#allocation5 + $0xad8] sm:$0xff]  ;;  %v2281_v12 = vpack.c.bf16 %v495_v6, %v491_v4  ;;  %v535_v2 = vld [vmem:[#allocation5 + $0xbf0] sm:$0xff]  ;;  %v542_v4 = vld [vmem:[#allocation5 + $0xc28] sm:$0xff] }
 0x13b   :  { %v544_v6 = vld [vmem:[#allocation5 + $0xc38] sm:$0xff] }
 0x13c   :  { %2006 = vmatpush1.bf16.msra.mxu0 %v2005_v15  ;;  %v501_v15 = vld [vmem:[#allocation5 + $0xae0] sm:$0xff]  ;;  %v564_v43 = vld [vmem:[#allocation5 + $0xcd8] sm:$0xff] }
 0x13d   :  { %2262 = vmatpush1.bf16.msra.mxu1 %v2261_v16  ;;  %2008 = vmatprep.subr.bf16.mxu0 %v2007_v17  ;;  %v499_v16 = vld [vmem:[#allocation5 + $0xad0] sm:$0xff]  ;;  %v2283_v17 = vpack.c.bf16 %v504_v10, %v500_v9  ;;  %v2029_v23 = vpack.c.bf16 %v501_v15, %v497_v14  ;;  %v2047_v9 = vpack.c.bf16 %v542_v4, %v538_v3  ;;  %v537_v10 = vld [vmem:[#allocation5 + $0xc00] sm:$0xff]  ;;  %v546_v15 = vld [vmem:[#allocation5 + $0xc48] sm:$0xff] }
 0x13e   :  { %2264 = vmatprep.subr.bf16.mxu1 %v2263_v21  ;;  %v508_v21 = vld [vmem:[#allocation5 + $0xb18] sm:$0xff]  ;;  %v2285_v24 = vpack.c.bf16 %v503_v18, %v499_v16  ;;  %v543_v14 = vld [vmem:[#allocation5 + $0xc30] sm:$0xff]  ;;  %v550_v16 = vld [vmem:[#allocation5 + $0xc68] sm:$0xff] }
 0x13f   :  { %v552_v18 = vld [vmem:[#allocation5 + $0xc78] sm:$0xff] }
 0x140   :  { %2010 = vmatpush1.bf16.msra.mxu0 %v2009_v27  ;;  %v509_v27 = vld [vmem:[#allocation5 + $0xb20] sm:$0xff]  ;;  %v568_v44 = vld [vmem:[#allocation5 + $0xcf8] sm:$0xff] }
 0x141   :  { %2266 = vmatpush1.bf16.msra.mxu1 %v2265_v28  ;;  %2012 = vmatprep.subr.bf16.mxu0 %v2011_v29  ;;  %v507_v28 = vld [vmem:[#allocation5 + $0xb10] sm:$0xff]  ;;  %v2287_v29 = vpack.c.bf16 %v512_v22, %v508_v21  ;;  %v2033_v35 = vpack.c.bf16 %v509_v27, %v505_v26  ;;  %v2051_v22 = vpack.c.bf16 %v550_v16, %v546_v15  ;;  %v572_v55 = vld [vmem:[#allocation5 + $0xd18] sm:$0xff] }
 0x142   :  { %2268 = vmatprep.subr.bf16.mxu1 %v2267_v33  ;;  %v516_v33 = vld [vmem:[#allocation5 + $0xb58] sm:$0xff]  ;;  %v2289_v36 = vpack.c.bf16 %v511_v30, %v507_v28  ;;  %v551_v27 = vld [vmem:[#allocation5 + $0xc70] sm:$0xff]  ;;  %v554_v28 = vld [vmem:[#allocation5 + $0xc88] sm:$0xff] }
 0x143   :  { %v556_v30 = vld [vmem:[#allocation5 + $0xc98] sm:$0xff] }
 0x144   :  { %2014 = vmatpush1.bf16.msra.mxu0 %v2013_v39  ;;  %v517_v39 = vld [vmem:[#allocation5 + $0xb60] sm:$0xff]  ;;  %v576_v56 = vld [vmem:[#allocation5 + $0xd38] sm:$0xff] }
 0x145   :  { %2270 = vmatpush1.bf16.msra.mxu1 %v2269_v40  ;;  %2016 = vmatprep.subr.bf16.mxu0 %v2015_v41  ;;  %v515_v40 = vld [vmem:[#allocation5 + $0xb50] sm:$0xff]  ;;  %v2291_v41 = vpack.c.bf16 %v520_v34, %v516_v33  ;;  %v2037_v47 = vpack.c.bf16 %v517_v39, %v513_v38  ;;  %v2311_v39 = vpack.c.bf16 %v560_v31, %v556_v30  ;;  %v580_v3 = vld [vmem:[#allocation5 + $0xd58] sm:$0xff] }
 0x146   :  { %2272 = vmatprep.subr.bf16.mxu1 %v2271_v45  ;;  %v524_v45 = vld [vmem:[#allocation5 + $0xb98] sm:$0xff]  ;;  %v2293_v48 = vpack.c.bf16 %v519_v42, %v515_v40  ;;  %v555_v38 = vld [vmem:[#allocation5 + $0xc90] sm:$0xff]  ;;  %v566_v42 = vld [vmem:[#allocation5 + $0xce8] sm:$0xff] }
 0x147   :  { %v559_v40 = vld [vmem:[#allocation5 + $0xcb0] sm:$0xff]  ;;  %v584_v4 = vld [vmem:[#allocation5 + $0xd78] sm:$0xff] }
 0x148   :  { %2018 = vmatpush1.bf16.msra.mxu0 %v2017_v51  ;;  %v525_v51 = vld [vmem:[#allocation5 + $0xba0] sm:$0xff]  ;;  %v588_v15 = vld [vmem:[#allocation5 + $0xd98] sm:$0xff] }
 0x149   :  { %2274 = vmatpush1.bf16.msra.mxu1 %v2273_v52  ;;  %2020 = vmatprep.subr.bf16.mxu0 %v2019_v53  ;;  %v523_v52 = vld [vmem:[#allocation5 + $0xb90] sm:$0xff]  ;;  %v2295_v53 = vpack.c.bf16 %v528_v46, %v524_v45  ;;  %v2041_v59 = vpack.c.bf16 %v525_v51, %v521_v50  ;;  %v2313_v46 = vpack.c.bf16 %v559_v40, %v555_v38  ;;  %v592_v16 = vld [vmem:[#allocation5 + $0xdb8] sm:$0xff]  ;;  %v606_v38 = vld [vmem:[#allocation5 + $0xe28] sm:$0xff] }
 0x14a   :  { %2276 = vmatprep.subr.bf16.mxu1 %v2275_v57  ;;  %v532_v57 = vld [vmem:[#allocation5 + $0xbd8] sm:$0xff]  ;;  %v2297_v60 = vpack.c.bf16 %v527_v54, %v523_v52  ;;  %v563_v50 = vld [vmem:[#allocation5 + $0xcd0] sm:$0xff]  ;;  %v2315_v51 = vpack.c.bf16 %v568_v44, %v564_v43  ;;  %v574_v54 = vld [vmem:[#allocation5 + $0xd28] sm:$0xff] }
 0x14b   :  { %v567_v52 = vld [vmem:[#allocation5 + $0xcf0] sm:$0xff]  ;;  %v608_v40 = vld [vmem:[#allocation5 + $0xe38] sm:$0xff]  ;;  %v601_v44 = vld [vmem:[#allocation5 + $0xe00] sm:$0xff] }
 0x14c   :  { %2022 = vmatpush1.bf16.msra.mxu0 %v2021_v63  ;;  %v533_v63 = vld [vmem:[#allocation5 + $0xbe0] sm:$0xff] }
 0x14d   :  { %2278 = vmatpush1.bf16.msra.mxu1 %v2277_v0  ;;  %2024 = vmatprep.subr.bf16.mxu0 %v2023_v1  ;;  %v531_v0 = vld [vmem:[#allocation5 + $0xbd0] sm:$0xff]  ;;  %v2299_v1 = vpack.c.bf16 %v536_v58, %v532_v57  ;;  %v2045_v7 = vpack.c.bf16 %v533_v63, %v529_v62  ;;  %v2317_v58 = vpack.c.bf16 %v567_v52, %v563_v50  ;;  %v614_v50 = vld [vmem:[#allocation5 + $0xe68] sm:$0xff]  ;;  %v616_v52 = vld [vmem:[#allocation5 + $0xe78] sm:$0xff] }
 0x14e   :  { %2280 = vmatprep.subr.bf16.mxu1 %v2279_v5  ;;  %v540_v5 = vld [vmem:[#allocation5 + $0xc18] sm:$0xff]  ;;  %v2301_v8 = vpack.c.bf16 %v535_v2, %v531_v0  ;;  %v571_v62 = vld [vmem:[#allocation5 + $0xd10] sm:$0xff]  ;;  %v2319_v63 = vpack.c.bf16 %v576_v56, %v572_v55  ;;  %v582_v2 = vld [vmem:[#allocation5 + $0xd68] sm:$0xff] }
 0x14f   :  { %v575_v0 = vld [vmem:[#allocation5 + $0xd30] sm:$0xff]  ;;  %v609_v56 = vld [vmem:[#allocation5 + $0xe40] sm:$0xff] }
 0x150   :  { %2026 = vmatpush1.bf16.msra.mxu0 %v2025_v11  ;;  %v541_v11 = vld [vmem:[#allocation5 + $0xc20] sm:$0xff] }
 0x151   :  { %2282 = vmatpush1.bf16.msra.mxu1 %v2281_v12  ;;  %2028 = vmatprep.subr.bf16.mxu0 %v2027_v13  ;;  %v539_v12 = vld [vmem:[#allocation5 + $0xc10] sm:$0xff]  ;;  %v2303_v13 = vpack.c.bf16 %v544_v6, %v540_v5  ;;  %v2049_v20 = vpack.c.bf16 %v541_v11, %v537_v10  ;;  %v2321_v6 = vpack.c.bf16 %v575_v0, %v571_v62  ;;  %v622_v62 = vld [vmem:[#allocation5 + $0xea8] sm:$0xff]  ;;  %v624_v0 = vld [vmem:[#allocation5 + $0xeb8] sm:$0xff] }
 0x152   :  { %2284 = vmatprep.subr.bf16.mxu1 %v2283_v17  ;;  %v548_v17 = vld [vmem:[#allocation5 + $0xc58] sm:$0xff]  ;;  %v2305_v21 = vpack.c.bf16 %v543_v14, %v539_v12  ;;  %v579_v10 = vld [vmem:[#allocation5 + $0xd50] sm:$0xff]  ;;  %v2323_v11 = vpack.c.bf16 %v584_v4, %v580_v3  ;;  %v590_v14 = vld [vmem:[#allocation5 + $0xda8] sm:$0xff] }
 0x153   :  { %v2307_v26 = vpack.c.bf16 %v552_v18, %v548_v17  ;;  %v583_v12 = vld [vmem:[#allocation5 + $0xd70] sm:$0xff]  ;;  %v617_v4 = vld [vmem:[#allocation5 + $0xe80] sm:$0xff] }
 0x154   :  { %2030 = vmatpush1.bf16.msra.mxu0 %v2029_v23  ;;  %v545_v23 = vld [vmem:[#allocation5 + $0xc40] sm:$0xff]  ;;  %v2325_v18 = vpack.c.bf16 %v583_v12, %v579_v10  ;;  %v630_v10 = vld [vmem:[#allocation5 + $0xee8] sm:$0xff]  ;;  %v632_v12 = vld [vmem:[#allocation5 + $0xef8] sm:$0xff] }
 0x155   :  { %2286 = vmatpush1.bf16.msra.mxu1 %v2285_v24  ;;  %2032 = vmatprep.subr.bf16.mxu0 %v2031_v25  ;;  %v549_v24 = vld [vmem:[#allocation5 + $0xc60] sm:$0xff]  ;;  %v547_v25 = vld [vmem:[#allocation5 + $0xc50] sm:$0xff] }
 0x156   :  { %2288 = vmatprep.subr.bf16.mxu1 %v2287_v29  ;;  %v558_v29 = vld [vmem:[#allocation5 + $0xca8] sm:$0xff]  ;;  %v2053_v33 = vpack.c.bf16 %v549_v24, %v545_v23  ;;  %v2309_v34 = vpack.c.bf16 %v551_v27, %v547_v25  ;;  %v2327_v23 = vpack.c.bf16 %v592_v16, %v588_v15  ;;  %v591_v24 = vld [vmem:[#allocation5 + $0xdb0] sm:$0xff]  ;;  %v596_v27 = vld [vmem:[#allocation5 + $0xdd8] sm:$0xff] }
 0x157   :  { %v594_v25 = vld [vmem:[#allocation5 + $0xdc8] sm:$0xff]  ;;  %v625_v16 = vld [vmem:[#allocation5 + $0xec0] sm:$0xff] }
 0x158   :  { %2034 = vmatpush1.bf16.msra.mxu0 %v2033_v35  ;;  %v2055_v35 = vpack.c.bf16 %v558_v29, %v554_v28  ;;  %v600_v28 = vld [vmem:[#allocation5 + $0xdf8] sm:$0xff] }
 0x159   :  { %2290 = vmatpush1.bf16.msra.mxu1 %v2289_v36  ;;  %2036 = vmatprep.subr.bf16.mxu0 %v2035_v37  ;;  %v553_v36 = vld [vmem:[#allocation5 + $0xc80] sm:$0xff] }
 0x15a   :  { %2292 = vmatprep.subr.bf16.mxu1 %v2291_v41  ;;  %v557_v37 = vld [vmem:[#allocation5 + $0xca0] sm:$0xff]  ;;  %v562_v41 = vld [vmem:[#allocation5 + $0xcc8] sm:$0xff] }
 0x15b   :  { %v2057_v45 = vpack.c.bf16 %v557_v37, %v553_v36  ;;  %v599_v36 = vld [vmem:[#allocation5 + $0xdf0] sm:$0xff]  ;;  %v602_v37 = vld [vmem:[#allocation5 + $0xe08] sm:$0xff] }
 0x15c   :  { %2038 = vmatpush1.bf16.msra.mxu0 %v2037_v47  ;;  %v2059_v47 = vpack.c.bf16 %v566_v42, %v562_v41  ;;  %v2079_v43 = vpack.c.bf16 %v606_v38, %v602_v37 }
 0x15d   :  { %2294 = vmatpush1.bf16.msra.mxu1 %v2293_v48  ;;  %2040 = vmatprep.subr.bf16.mxu0 %v2039_v49  ;;  %v561_v48 = vld [vmem:[#allocation5 + $0xcc0] sm:$0xff] }
 0x15e   :  { %2296 = vmatprep.subr.bf16.mxu1 %v2295_v53  ;;  %v565_v49 = vld [vmem:[#allocation5 + $0xce0] sm:$0xff]  ;;  %v570_v53 = vld [vmem:[#allocation5 + $0xd08] sm:$0xff] }
 0x15f   :  { %v2061_v57 = vpack.c.bf16 %v565_v49, %v561_v48  ;;  %v607_v48 = vld [vmem:[#allocation5 + $0xe30] sm:$0xff]  ;;  %v610_v49 = vld [vmem:[#allocation5 + $0xe48] sm:$0xff] }
 0x160   :  { %2042 = vmatpush1.bf16.msra.mxu0 %v2041_v59  ;;  %v2063_v59 = vpack.c.bf16 %v574_v54, %v570_v53  ;;  %v2083_v55 = vpack.c.bf16 %v614_v50, %v610_v49 }
 0x161   :  { %2298 = vmatpush1.bf16.msra.mxu1 %v2297_v60  ;;  %2044 = vmatprep.subr.bf16.mxu0 %v2043_v61  ;;  %v569_v60 = vld [vmem:[#allocation5 + $0xd00] sm:$0xff] }
 0x162   :  { %2300 = vmatprep.subr.bf16.mxu1 %v2299_v1  ;;  %v573_v61 = vld [vmem:[#allocation5 + $0xd20] sm:$0xff]  ;;  %v578_v1 = vld [vmem:[#allocation5 + $0xd48] sm:$0xff] }
 0x163   :  { %v2065_v5 = vpack.c.bf16 %v573_v61, %v569_v60  ;;  %v615_v60 = vld [vmem:[#allocation5 + $0xe70] sm:$0xff]  ;;  %v618_v61 = vld [vmem:[#allocation5 + $0xe88] sm:$0xff] }
 0x164   :  { %2046 = vmatpush1.bf16.msra.mxu0 %v2045_v7  ;;  %v2067_v7 = vpack.c.bf16 %v582_v2, %v578_v1  ;;  %v2087_v3 = vpack.c.bf16 %v622_v62, %v618_v61 }
 0x165   :  { %2302 = vmatpush1.bf16.msra.mxu1 %v2301_v8  ;;  %2048 = vmatprep.subr.bf16.mxu0 %v2047_v9  ;;  %v577_v8 = vld [vmem:[#allocation5 + $0xd40] sm:$0xff] }
 0x166   :  { %2304 = vmatprep.subr.bf16.mxu1 %v2303_v13  ;;  %v581_v9 = vld [vmem:[#allocation5 + $0xd60] sm:$0xff]  ;;  %v586_v13 = vld [vmem:[#allocation5 + $0xd88] sm:$0xff] }
 0x167   :  { %894 = vmatmul.mubr.f32.vlgmr.msra.gmra.mrb[0].mxu0 %v149_v19  ;;  %v2069_v17 = vpack.c.bf16 %v581_v9, %v577_v8  ;;  %v623_v8 = vld [vmem:[#allocation5 + $0xeb0] sm:$0xff]  ;;  %v626_v9 = vld [vmem:[#allocation5 + $0xec8] sm:$0xff] }
 0x168   :  { %2050 = vmatpush1.bf16.msra.mxu0 %v2049_v20  ;;  %1178 = vmatmul.mubr.f32.vlgmr.msra.gmra.mrb[0].mxu1 %v149_v19  ;;  %v2071_v19 = vpack.c.bf16 %v590_v14, %v586_v13  ;;  %v585_v20 = vld [vmem:[#allocation5 + $0xd80] sm:$0xff]  ;;  %v2091_v15 = vpack.c.bf16 %v630_v10, %v626_v9 }
 0x169   :  { %2306 = vmatpush1.bf16.msra.mxu1 %v2305_v21  ;;  %2052 = vmatprep.subr.bf16.mxu0 %v2051_v22  ;;  %v589_v21 = vld [vmem:[#allocation5 + $0xda0] sm:$0xff]  ;;  %v587_v22 = vld [vmem:[#allocation5 + $0xd90] sm:$0xff] }
 0x16a   :  { %2308 = vmatprep.subr.bf16.mxu1 %v2307_v26  ;;  %964 = vmatprep.mubr.f32.mxu0 %v152_v32  ;;  %v598_v26 = vld [vmem:[#allocation5 + $0xde8] sm:$0xff]  ;;  %v2073_v29 = vpack.c.bf16 %v589_v21, %v585_v20  ;;  %v2329_v30 = vpack.c.bf16 %v591_v24, %v587_v22  ;;  %v631_v20 = vld [vmem:[#allocation5 + $0xef0] sm:$0xff]  ;;  %v640_v24 = vld [vmem:[#allocation5 + $0xf38] sm:$0xff] }
 0x16b   :  { %1248 = vmatprep.mubr.f32.mxu1 %v152_v32  ;;  %v2075_v31 = vpack.c.bf16 %v598_v26, %v594_v25  ;;  %v593_v32 = vld [vmem:[#allocation5 + $0xdc0] sm:$0xff]  ;;  %v634_v21 = vld [vmem:[#allocation5 + $0xf08] sm:$0xff] }
 0x16c   :  { %2054 = vmatpush1.bf16.msra.mxu0 %v2053_v33  ;;  %v597_v33 = vld [vmem:[#allocation5 + $0xde0] sm:$0xff]  ;;  %v638_v22 = vld [vmem:[#allocation5 + $0xf28] sm:$0xff] }
 0x16d   :  { %2310 = vmatpush1.bf16.msra.mxu1 %v2309_v34  ;;  %2056 = vmatprep.subr.bf16.mxu0 %v2055_v35  ;;  %v595_v34 = vld [vmem:[#allocation5 + $0xdd0] sm:$0xff]  ;;  %v2331_v35 = vpack.c.bf16 %v600_v28, %v596_v27  ;;  %v2077_v41 = vpack.c.bf16 %v597_v33, %v593_v32  ;;  %v2095_v27 = vpack.c.bf16 %v638_v22, %v634_v21  ;;  %v633_v28 = vld [vmem:[#allocation5 + $0xf00] sm:$0xff]  ;;  %v642_v33 = vld [vmem:[#allocation5 + $0xf48] sm:$0xff] }
 0x16e   :  { %2312 = vmatprep.subr.bf16.mxu1 %v2311_v39  ;;  %v604_v39 = vld [vmem:[#allocation5 + $0xe18] sm:$0xff]  ;;  %v2333_v42 = vpack.c.bf16 %v599_v36, %v595_v34  ;;  %v639_v32 = vld [vmem:[#allocation5 + $0xf30] sm:$0xff]  ;;  %v646_v34 = vld [vmem:[#allocation5 + $0xf68] sm:$0xff] }
 0x16f   :  { %v648_v36 = vld [vmem:[#allocation5 + $0xf78] sm:$0xff]  ;;  %v1259_v10 = vld [vmem:[#allocation8] sm:$0xff] }
 0x170   :  { %2058 = vmatpush1.bf16.msra.mxu0 %v2057_v45  ;;  %v605_v45 = vld [vmem:[#allocation5 + $0xe20] sm:$0xff] }
 0x171   :  { %2314 = vmatpush1.bf16.msra.mxu1 %v2313_v46  ;;  %2060 = vmatprep.subr.bf16.mxu0 %v2059_v47  ;;  %v603_v46 = vld [vmem:[#allocation5 + $0xe10] sm:$0xff]  ;;  %v2335_v47 = vpack.c.bf16 %v608_v40, %v604_v39  ;;  %v2081_v53 = vpack.c.bf16 %v605_v45, %v601_v44  ;;  %v2099_v39 = vpack.c.bf16 %v646_v34, %v642_v33  ;;  %v641_v40 = vld [vmem:[#allocation5 + $0xf40] sm:$0xff]  ;;  %v650_v45 = vld [vmem:[#allocation5 + $0xf88] sm:$0xff] }
 0x172   :  { %2316 = vmatprep.subr.bf16.mxu1 %v2315_v51  ;;  %v612_v51 = vld [vmem:[#allocation5 + $0xe58] sm:$0xff]  ;;  %v2337_v54 = vpack.c.bf16 %v607_v48, %v603_v46  ;;  %v647_v44 = vld [vmem:[#allocation5 + $0xf70] sm:$0xff]  ;;  %v654_v46 = vld [vmem:[#allocation5 + $0xfa8] sm:$0xff] }
 0x173   :  { %v656_v48 = vld [vmem:[#allocation5 + $0xfb8] sm:$0xff] }
 0x174   :  { %2062 = vmatpush1.bf16.msra.mxu0 %v2061_v57  ;;  %v613_v57 = vld [vmem:[#allocation5 + $0xe60] sm:$0xff] }
 0x175   :  { %2318 = vmatpush1.bf16.msra.mxu1 %v2317_v58  ;;  %2064 = vmatprep.subr.bf16.mxu0 %v2063_v59  ;;  %v611_v58 = vld [vmem:[#allocation5 + $0xe50] sm:$0xff]  ;;  %v2339_v59 = vpack.c.bf16 %v616_v52, %v612_v51  ;;  %v2085_v1 = vpack.c.bf16 %v613_v57, %v609_v56  ;;  %v2103_v51 = vpack.c.bf16 %v654_v46, %v650_v45  ;;  %v649_v52 = vld [vmem:[#allocation5 + $0xf80] sm:$0xff]  ;;  %v658_v57 = vld [vmem:[#allocation5 + $0xfc8] sm:$0xff] }
 0x176   :  { %2320 = vmatprep.subr.bf16.mxu1 %v2319_v63  ;;  %v620_v63 = vld [vmem:[#allocation5 + $0xe98] sm:$0xff]  ;;  %v2341_v2 = vpack.c.bf16 %v615_v60, %v611_v58  ;;  %v655_v56 = vld [vmem:[#allocation5 + $0xfb0] sm:$0xff]  ;;  %v662_v58 = vld [vmem:[#allocation5 + $0xfe8] sm:$0xff] }
 0x177   :  { %v664_v60 = vld [vmem:[#allocation5 + $0xff8] sm:$0xff] }
 0x178   :  { %2066 = vmatpush1.bf16.msra.mxu0 %v2065_v5  ;;  %v621_v5 = vld [vmem:[#allocation5 + $0xea0] sm:$0xff] }
 0x179   :  { %2322 = vmatpush1.bf16.msra.mxu1 %v2321_v6  ;;  %2068 = vmatprep.subr.bf16.mxu0 %v2067_v7  ;;  %v619_v6 = vld [vmem:[#allocation5 + $0xe90] sm:$0xff]  ;;  %v2343_v7 = vpack.c.bf16 %v624_v0, %v620_v63  ;;  %v2089_v13 = vpack.c.bf16 %v621_v5, %v617_v4  ;;  %v2107_v63 = vpack.c.bf16 %v662_v58, %v658_v57  ;;  %v657_v0 = vld [vmem:[#allocation5 + $0xfc0] sm:$0xff] }
 0x17a   :  { %2324 = vmatprep.subr.bf16.mxu1 %v2323_v11  ;;  %v628_v11 = vld [vmem:[#allocation5 + $0xed8] sm:$0xff]  ;;  %v2345_v14 = vpack.c.bf16 %v623_v8, %v619_v6  ;;  %v663_v4 = vld [vmem:[#allocation5 + $0xff0] sm:$0xff] }
 0x17b   :  { %v1260_v5 = vld [vmem:[#allocation8 + $0x8] sm:$0xff]  ;;  %v1262_v6 = vld [vmem:[#allocation8 + $0x18] sm:$0xff] }
 0x17c   :  { %2070 = vmatpush1.bf16.msra.mxu0 %v2069_v17  ;;  %v629_v17 = vld [vmem:[#allocation5 + $0xee0] sm:$0xff]  ;;  %v2367_v9 = vpack.c.bf16 %v1262_v6, %v1260_v5 }
 0x17d   :  { %2326 = vmatpush1.bf16.msra.mxu1 %v2325_v18  ;;  %2072 = vmatprep.subr.bf16.mxu0 %v2071_v19  ;;  %v627_v18 = vld [vmem:[#allocation5 + $0xed0] sm:$0xff]  ;;  %v2347_v19 = vpack.c.bf16 %v632_v12, %v628_v11  ;;  %v2093_v25 = vpack.c.bf16 %v629_v17, %v625_v16  ;;  %v1263_v17 = vld [vmem:[#allocation8 + $0x20] sm:$0xff] }
 0x17e   :  { %2328 = vmatprep.subr.bf16.mxu1 %v2327_v23  ;;  %v636_v23 = vld [vmem:[#allocation5 + $0xf18] sm:$0xff]  ;;  %v2349_v26 = vpack.c.bf16 %v631_v20, %v627_v18  ;;  %v1264_v12 = vld [vmem:[#allocation8 + $0x28] sm:$0xff] }
 0x17f   :  { %v1261_v11 = vld [vmem:[#allocation8 + $0x10] sm:$0xff]  ;;  %v1270_v20 = vld [vmem:[#allocation8 + $0x58] sm:$0xff] }
 0x180   :  { %2074 = vmatpush1.bf16.msra.mxu0 %v2073_v29  ;;  %v637_v29 = vld [vmem:[#allocation5 + $0xf20] sm:$0xff]  ;;  %v1265_v18 = vld [vmem:[#allocation8 + $0x30] sm:$0xff] }
 0x181   :  { %2330 = vmatpush1.bf16.msra.mxu1 %v2329_v30  ;;  %2076 = vmatprep.subr.bf16.mxu0 %v2075_v31  ;;  %v635_v30 = vld [vmem:[#allocation5 + $0xf10] sm:$0xff]  ;;  %v2351_v31 = vpack.c.bf16 %v640_v24, %v636_v23  ;;  %v2097_v37 = vpack.c.bf16 %v637_v29, %v633_v28  ;;  %v2373_v21 = vpack.c.bf16 %v1265_v18, %v1263_v17  ;;  %v1267_v23 = vld [vmem:[#allocation8 + $0x40] sm:$0xff] }
 0x182   :  { %2332 = vmatprep.subr.bf16.mxu1 %v2331_v35  ;;  %v644_v35 = vld [vmem:[#allocation5 + $0xf58] sm:$0xff]  ;;  %v2353_v38 = vpack.c.bf16 %v639_v32, %v635_v30  ;;  %v1271_v29 = vld [vmem:[#allocation8 + $0x60] sm:$0xff] }
 0x183   :  { %v1269_v24 = vld [vmem:[#allocation8 + $0x50] sm:$0xff]  ;;  %v1278_v32 = vld [vmem:[#allocation8 + $0x98] sm:$0xff] }
 0x184   :  { %2078 = vmatpush1.bf16.msra.mxu0 %v2077_v41  ;;  %v645_v41 = vld [vmem:[#allocation5 + $0xf60] sm:$0xff]  ;;  %v1273_v30 = vld [vmem:[#allocation8 + $0x70] sm:$0xff] }
 0x185   :  { %2334 = vmatpush1.bf16.msra.mxu1 %v2333_v42  ;;  %2080 = vmatprep.subr.bf16.mxu0 %v2079_v43  ;;  %v643_v42 = vld [vmem:[#allocation5 + $0xf50] sm:$0xff]  ;;  %v2355_v43 = vpack.c.bf16 %v648_v36, %v644_v35  ;;  %v2101_v49 = vpack.c.bf16 %v645_v41, %v641_v40  ;;  %v2381_v33 = vpack.c.bf16 %v1273_v30, %v1271_v29  ;;  %v1275_v35 = vld [vmem:[#allocation8 + $0x80] sm:$0xff] }
 0x186   :  { %2336 = vmatprep.subr.bf16.mxu1 %v2335_v47  ;;  %v652_v47 = vld [vmem:[#allocation5 + $0xf98] sm:$0xff]  ;;  %v2357_v50 = vpack.c.bf16 %v647_v44, %v643_v42  ;;  %v1279_v41 = vld [vmem:[#allocation8 + $0xa0] sm:$0xff] }
 0x187   :  { %v1277_v36 = vld [vmem:[#allocation8 + $0x90] sm:$0xff]  ;;  %v1286_v44 = vld [vmem:[#allocation8 + $0xd8] sm:$0xff] }
 0x188   :  { %2082 = vmatpush1.bf16.msra.mxu0 %v2081_v53  ;;  %v653_v53 = vld [vmem:[#allocation5 + $0xfa0] sm:$0xff]  ;;  %v1281_v42 = vld [vmem:[#allocation8 + $0xb0] sm:$0xff] }
 0x189   :  { %2338 = vmatpush1.bf16.msra.mxu1 %v2337_v54  ;;  %2084 = vmatprep.subr.bf16.mxu0 %v2083_v55  ;;  %v651_v54 = vld [vmem:[#allocation5 + $0xf90] sm:$0xff]  ;;  %v2359_v55 = vpack.c.bf16 %v656_v48, %v652_v47  ;;  %v2105_v61 = vpack.c.bf16 %v653_v53, %v649_v52  ;;  %v2389_v45 = vpack.c.bf16 %v1281_v42, %v1279_v41  ;;  %v1283_v47 = vld [vmem:[#allocation8 + $0xc0] sm:$0xff]  ;;  %v1326_v41 = vld [vmem:[#allocation8 + $0x218] sm:$0xff] }
 0x18a   :  { %2340 = vmatprep.subr.bf16.mxu1 %v2339_v59  ;;  %v660_v59 = vld [vmem:[#allocation5 + $0xfd8] sm:$0xff]  ;;  %v2361_v62 = vpack.c.bf16 %v655_v56, %v651_v54  ;;  %v1287_v53 = vld [vmem:[#allocation8 + $0xe0] sm:$0xff] }
 0x18b   :  { %v1285_v48 = vld [vmem:[#allocation8 + $0xd0] sm:$0xff]  ;;  %v1294_v56 = vld [vmem:[#allocation8 + $0x118] sm:$0xff] }
 0x18c   :  { %2086 = vmatpush1.bf16.msra.mxu0 %v2085_v1  ;;  %v661_v1 = vld [vmem:[#allocation5 + $0xfe0] sm:$0xff]  ;;  %v1289_v54 = vld [vmem:[#allocation8 + $0xf0] sm:$0xff] }
 0x18d   :  { %2342 = vmatpush1.bf16.msra.mxu1 %v2341_v2  ;;  %2088 = vmatprep.subr.bf16.mxu0 %v2087_v3  ;;  %v659_v2 = vld [vmem:[#allocation5 + $0xfd0] sm:$0xff]  ;;  %v2363_v3 = vpack.c.bf16 %v664_v60, %v660_v59  ;;  %v2397_v57 = vpack.c.bf16 %v1289_v54, %v1287_v53  ;;  %v1291_v59 = vld [vmem:[#allocation8 + $0x100] sm:$0xff] }
 0x18e   :  { %2344 = vmatprep.subr.bf16.mxu1 %v2343_v7  ;;  %v2109_v7 = vpack.c.bf16 %v661_v1, %v657_v0  ;;  %v2365_v8 = vpack.c.bf16 %v663_v4, %v659_v2  ;;  %v1293_v60 = vld [vmem:[#allocation8 + $0x110] sm:$0xff]  ;;  %v1295_v1 = vld [vmem:[#allocation8 + $0x120] sm:$0xff]  ;;  %v1302_v4 = vld [vmem:[#allocation8 + $0x158] sm:$0xff] }
 0x18f   :  { %v1297_v2 = vld [vmem:[#allocation8 + $0x130] sm:$0xff]  ;;  %v1546_v53 = vld [vmem:[#allocation11 + $0x18] sm:$0xff]  ;;  %v1563_v54 = vld [vmem:[#allocation11 + $0xa0] sm:$0xff] }
 0x190   :  { %2090 = vmatpush1.bf16.msra.mxu0 %v2089_v13  ;;  %v1266_v13 = vld [vmem:[#allocation8 + $0x38] sm:$0xff]  ;;  %v2405_v5 = vpack.c.bf16 %v1297_v2, %v1295_v1  ;;  %v1567_v2 = vld [vmem:[#allocation11 + $0xc0] sm:$0xff] }
 0x191   :  { %2346 = vmatpush1.bf16.msra.mxu1 %v2345_v14  ;;  %2092 = vmatprep.subr.bf16.mxu0 %v2091_v15  ;;  %v151_v14 = vld [vmem:[#allocation2 + $0x30] sm:$0xff]  ;;  %v2369_v15 = vpack.c.bf16 %v1261_v11, %v1259_v10  ;;  %v2371_v16 = vpack.c.bf16 %v1266_v13, %v1264_v12  ;;  %v1306_v10 = vld [vmem:[#allocation8 + $0x178] sm:$0xff]  ;;  %v1303_v13 = vld [vmem:[#allocation8 + $0x160] sm:$0xff] }
 0x192   :  { %2348 = vmatprep.subr.bf16.mxu1 %v2347_v19  ;;  %v1268_v19 = vld [vmem:[#allocation8 + $0x48] sm:$0xff]  ;;  %v1550_v1 = vld [vmem:[#allocation11 + $0x38] sm:$0xff] }
 0x193   :  { %v2375_v22 = vpack.c.bf16 %v1270_v20, %v1268_v19  ;;  %v1307_v19 = vld [vmem:[#allocation8 + $0x180] sm:$0xff]  ;;  %v1309_v20 = vld [vmem:[#allocation8 + $0x190] sm:$0xff] }
 0x194   :  { %2094 = vmatpush1.bf16.msra.mxu0 %v2093_v25  ;;  %v1272_v25 = vld [vmem:[#allocation8 + $0x68] sm:$0xff] }
 0x195   :  { %2350 = vmatpush1.bf16.msra.mxu1 %v2349_v26  ;;  %2096 = vmatprep.subr.bf16.mxu0 %v2095_v27  ;;  %v1274_v26 = vld [vmem:[#allocation8 + $0x78] sm:$0xff]  ;;  %v2377_v27 = vpack.c.bf16 %v1269_v24, %v1267_v23  ;;  %v2417_v23 = vpack.c.bf16 %v1309_v20, %v1307_v19 }
 0x196   :  { %2352 = vmatprep.subr.bf16.mxu1 %v2351_v31  ;;  %v2379_v28 = vpack.c.bf16 %v1274_v26, %v1272_v25  ;;  %v1276_v31 = vld [vmem:[#allocation8 + $0x88] sm:$0xff]  ;;  %v1311_v25 = vld [vmem:[#allocation8 + $0x1a0] sm:$0xff]  ;;  %v1313_v26 = vld [vmem:[#allocation8 + $0x1b0] sm:$0xff] }
 0x197   :  { %v2383_v34 = vpack.c.bf16 %v1278_v32, %v1276_v31  ;;  %v2421_v29 = vpack.c.bf16 %v1313_v26, %v1311_v25  ;;  %v1315_v31 = vld [vmem:[#allocation8 + $0x1c0] sm:$0xff]  ;;  %v1317_v32 = vld [vmem:[#allocation8 + $0x1d0] sm:$0xff] }
 0x198   :  { %2098 = vmatpush1.bf16.msra.mxu0 %v2097_v37  ;;  %v1280_v37 = vld [vmem:[#allocation8 + $0xa8] sm:$0xff] }
 0x199   :  { %2354 = vmatpush1.bf16.msra.mxu1 %v2353_v38  ;;  %2100 = vmatprep.subr.bf16.mxu0 %v2099_v39  ;;  %v1282_v38 = vld [vmem:[#allocation8 + $0xb8] sm:$0xff]  ;;  %v2385_v39 = vpack.c.bf16 %v1277_v36, %v1275_v35 }
 0x19a   :  { %2356 = vmatprep.subr.bf16.mxu1 %v2355_v43  ;;  %v2387_v40 = vpack.c.bf16 %v1282_v38, %v1280_v37  ;;  %v1284_v43 = vld [vmem:[#allocation8 + $0xc8] sm:$0xff]  ;;  %v1322_v35 = vld [vmem:[#allocation8 + $0x1f8] sm:$0xff]  ;;  %v1319_v37 = vld [vmem:[#allocation8 + $0x1e0] sm:$0xff] }
 0x19b   :  { %v2391_v46 = vpack.c.bf16 %v1286_v44, %v1284_v43  ;;  %v1321_v38 = vld [vmem:[#allocation8 + $0x1f0] sm:$0xff]  ;;  %v1559_v43 = vld [vmem:[#allocation11 + $0x80] sm:$0xff] }
 0x19c   :  { %2102 = vmatpush1.bf16.msra.mxu0 %v2101_v49  ;;  %v1288_v49 = vld [vmem:[#allocation8 + $0xe8] sm:$0xff] }
 0x19d   :  { %2358 = vmatpush1.bf16.msra.mxu1 %v2357_v50  ;;  %2104 = vmatprep.subr.bf16.mxu0 %v2103_v51  ;;  %v1290_v50 = vld [vmem:[#allocation8 + $0xf8] sm:$0xff]  ;;  %v2393_v51 = vpack.c.bf16 %v1285_v48, %v1283_v47  ;;  %v1560_v44 = vld [vmem:[#allocation11 + $0x88] sm:$0xff] }
 0x19e   :  { %2360 = vmatprep.subr.bf16.mxu1 %v2359_v55  ;;  %v2395_v52 = vpack.c.bf16 %v1290_v50, %v1288_v49  ;;  %v1292_v55 = vld [vmem:[#allocation8 + $0x108] sm:$0xff]  ;;  %v1561_v48 = vld [vmem:[#allocation11 + $0x90] sm:$0xff]  ;;  %v1562_v49 = vld [vmem:[#allocation11 + $0x98] sm:$0xff] }
 0x19f   :  { %v2399_v58 = vpack.c.bf16 %v1294_v56, %v1292_v55  ;;  %v1544_v47 = vld [vmem:[#allocation11 + $0x8] sm:$0xff] }
 0x1a0   :  { %2106 = vmatpush1.bf16.msra.mxu0 %v2105_v61  ;;  %v1296_v61 = vld [vmem:[#allocation8 + $0x128] sm:$0xff] }
 0x1a1   :  { %2362 = vmatpush1.bf16.msra.mxu1 %v2361_v62  ;;  %2108 = vmatprep.subr.bf16.mxu0 %v2107_v63  ;;  %v1298_v62 = vld [vmem:[#allocation8 + $0x138] sm:$0xff]  ;;  %v2401_v63 = vpack.c.bf16 %v1293_v60, %v1291_v59  ;;  %v1564_v55 = vld [vmem:[#allocation11 + $0xa8] sm:$0xff] }
 0x1a2   :  { %2364 = vmatprep.subr.bf16.mxu1 %v2363_v3  ;;  %v2403_v0 = vpack.c.bf16 %v1298_v62, %v1296_v61  ;;  %v1300_v3 = vld [vmem:[#allocation8 + $0x148] sm:$0xff]  ;;  %v1565_v60 = vld [vmem:[#allocation11 + $0xb0] sm:$0xff]  ;;  %v1566_v61 = vld [vmem:[#allocation11 + $0xb8] sm:$0xff] }
 0x1a3   :  { %v2407_v6 = vpack.c.bf16 %v1302_v4, %v1300_v3  ;;  %v1548_v59 = vld [vmem:[#allocation11 + $0x28] sm:$0xff] }
 0x1a4   :  { %2110 = vmatpush1.bf16.msra.mxu0 %v2109_v7  ;;  %v1299_v7 = vld [vmem:[#allocation8 + $0x140] sm:$0xff]  ;;  %v1568_v3 = vld [vmem:[#allocation11 + $0xc8] sm:$0xff] }
 0x1a5   :  { %2366 = vmatpush1.bf16.msra.mxu1 %v2365_v8  ;;  %2368 = vmatprep.subr.bf16.mxu0 %v2367_v9  ;;  %v1301_v8 = vld [vmem:[#allocation8 + $0x150] sm:$0xff]  ;;  %v1304_v9 = vld [vmem:[#allocation8 + $0x168] sm:$0xff] }
 0x1a6   :  { %v2409_v11 = vpack.c.bf16 %v1301_v8, %v1299_v7  ;;  %v2411_v12 = vpack.c.bf16 %v1306_v10, %v1304_v9  ;;  %v1552_v7 = vld [vmem:[#allocation11 + $0x48] sm:$0xff]  ;;  %v1569_v8 = vld [vmem:[#allocation11 + $0xd0] sm:$0xff]  ;;  %v1570_v9 = vld [vmem:[#allocation11 + $0xd8] sm:$0xff] }
 0x1a7   :  { %965 = vmatmul.mubr.f32.vlgmr.msra.gmra.mrb[0].mxu0 %v151_v14 }
 0x1a8   :  { %1249 = vmatmul.mubr.f32.vlgmr.msra.gmra.mrb[0].mxu1 %v151_v14  ;;  %2370 = vmatpush1.bf16.msra.mxu0 %v2369_v15  ;;  %v1305_v14 = vld [vmem:[#allocation8 + $0x170] sm:$0xff]  ;;  %v1308_v15 = vld [vmem:[#allocation8 + $0x188] sm:$0xff] }
 0x1a9   :  { %2372 = vmatprep.subr.bf16.mxu0 %v2371_v16  ;;  %v1310_v16 = vld [vmem:[#allocation8 + $0x198] sm:$0xff]  ;;  %v2413_v17 = vpack.c.bf16 %v1305_v14, %v1303_v13  ;;  %v1571_v14 = vld [vmem:[#allocation11 + $0xe0] sm:$0xff] }
 0x1aa   :  { %v2415_v18 = vpack.c.bf16 %v1310_v16, %v1308_v15  ;;  %v1554_v13 = vld [vmem:[#allocation11 + $0x58] sm:$0xff]  ;;  %v1572_v15 = vld [vmem:[#allocation11 + $0xe8] sm:$0xff] }
 0x1ac   :  { %2374 = vmatpush1.bf16.msra.mxu0 %v2373_v21  ;;  %v1312_v21 = vld [vmem:[#allocation8 + $0x1a8] sm:$0xff] }
 0x1ad   :  { %2376 = vmatprep.subr.bf16.mxu0 %v2375_v22  ;;  %v1314_v22 = vld [vmem:[#allocation8 + $0x1b8] sm:$0xff] }
 0x1ae   :  { %v2419_v24 = vpack.c.bf16 %v1314_v22, %v1312_v21  ;;  %v3002_v21 = vld [vmem:[#allocation7] sm:$0xf] }
 0x1b0   :  { %2378 = vmatpush1.bf16.msra.mxu0 %v2377_v27  ;;  %v1316_v27 = vld [vmem:[#allocation8 + $0x1c8] sm:$0xff] }
 0x1b1   :  { %2380 = vmatprep.subr.bf16.mxu0 %v2379_v28  ;;  %v1318_v28 = vld [vmem:[#allocation8 + $0x1d8] sm:$0xff] }
 0x1b2   :  { %v2423_v30 = vpack.c.bf16 %v1318_v28, %v1316_v27 }
 0x1b4   :  { %2382 = vmatpush1.bf16.msra.mxu0 %v2381_v33  ;;  %v2425_v33 = vpack.c.bf16 %v1317_v32, %v1315_v31  ;;  %v1323_v31 = vld [vmem:[#allocation8 + $0x200] sm:$0xff]  ;;  %v1325_v32 = vld [vmem:[#allocation8 + $0x210] sm:$0xff] }
 0x1b5   :  { %2384 = vmatprep.subr.bf16.mxu0 %v2383_v34  ;;  %v1320_v34 = vld [vmem:[#allocation8 + $0x1e8] sm:$0xff] }
 0x1b6   :  { %v2427_v36 = vpack.c.bf16 %v1322_v35, %v1320_v34  ;;  %v1328_v35 = vld [vmem:[#allocation8 + $0x228] sm:$0xff] }
 0x1b8   :  { %2386 = vmatpush1.bf16.msra.mxu0 %v2385_v39  ;;  %v2429_v39 = vpack.c.bf16 %v1321_v38, %v1319_v37 }
 0x1b9   :  { %2388 = vmatprep.subr.bf16.mxu0 %v2387_v40  ;;  %v1324_v40 = vld [vmem:[#allocation8 + $0x208] sm:$0xff] }
 0x1ba   :  { %v2431_v42 = vpack.c.bf16 %v1326_v41, %v1324_v40 }
 0x1bc   :  { %2390 = vmatpush1.bf16.msra.mxu0 %v2389_v45  ;;  %v1543_v45 = vld [vmem:[#allocation11] sm:$0xff] }
 0x1bd   :  { %2392 = vmatprep.subr.bf16.mxu0 %v2391_v46  ;;  %v2495_v46 = vpack.c.bf16 %v1560_v44, %v1559_v43  ;;  %v2497_v50 = vpack.c.bf16 %v1544_v47, %v1543_v45  ;;  %v1329_v43 = vld [vmem:[#allocation8 + $0x230] sm:$0xff]  ;;  %v1332_v45 = vld [vmem:[#allocation8 + $0x248] sm:$0xff] }
 0x1bf   :  { %2496 = vmatprep.subr.bf16.mxu1 %v2495_v46  ;;  %v1334_v46 = vld [vmem:[#allocation8 + $0x258] sm:$0xff] }
 0x1c0   :  { %2394 = vmatpush1.bf16.msra.mxu0 %v2393_v51  ;;  %v2499_v51 = vpack.c.bf16 %v1562_v49, %v1561_v48  ;;  %2498 = vmatpush3.bf16.msra.mxu1 %v2497_v50  ;;  %v2439_v48 = vpack.c.bf16 %v1334_v46, %v1332_v45  ;;  %v1331_v49 = vld [vmem:[#allocation8 + $0x240] sm:$0xff]  ;;  %v1333_v50 = vld [vmem:[#allocation8 + $0x250] sm:$0xff]  ;;  %v1372_v46 = vld [vmem:[#allocation8 + $0x388] sm:$0xff] }
 0x1c1   :  { %2396 = vmatprep.subr.bf16.mxu0 %v2395_v52  ;;  %v1545_v52 = vld [vmem:[#allocation11 + $0x10] sm:$0xff] }
 0x1c2   :  { %v2501_v56 = vpack.c.bf16 %v1546_v53, %v1545_v52  ;;  %2500 = vmatprep.subr.bf16.mxu1 %v2499_v51  ;;  %v1336_v51 = vld [vmem:[#allocation8 + $0x268] sm:$0xff]  ;;  %v1338_v52 = vld [vmem:[#allocation8 + $0x278] sm:$0xff]  ;;  %v2441_v53 = vpack.c.bf16 %v1333_v50, %v1331_v49  ;;  %v1369_v45 = vld [vmem:[#allocation8 + $0x370] sm:$0xff] }
 0x1c3   :  { %v1371_v50 = vld [vmem:[#allocation8 + $0x380] sm:$0xff] }
 0x1c4   :  { %2398 = vmatpush1.bf16.msra.mxu0 %v2397_v57  ;;  %v2503_v57 = vpack.c.bf16 %v1564_v55, %v1563_v54  ;;  %2502 = vmatpush3.bf16.msra.mxu1 %v2501_v56  ;;  %v2443_v54 = vpack.c.bf16 %v1338_v52, %v1336_v51  ;;  %v1335_v55 = vld [vmem:[#allocation8 + $0x260] sm:$0xff]  ;;  %v1337_v56 = vld [vmem:[#allocation8 + $0x270] sm:$0xff]  ;;  %v1376_v52 = vld [vmem:[#allocation8 + $0x3a8] sm:$0xff] }
 0x1c5   :  { %2400 = vmatprep.subr.bf16.mxu0 %v2399_v58  ;;  %v1547_v58 = vld [vmem:[#allocation11 + $0x20] sm:$0xff]  ;;  %v1373_v51 = vld [vmem:[#allocation8 + $0x390] sm:$0xff] }
 0x1c6   :  { %v2505_v62 = vpack.c.bf16 %v1548_v59, %v1547_v58  ;;  %2504 = vmatprep.subr.bf16.mxu1 %v2503_v57  ;;  %v1340_v57 = vld [vmem:[#allocation8 + $0x288] sm:$0xff]  ;;  %v1342_v58 = vld [vmem:[#allocation8 + $0x298] sm:$0xff]  ;;  %v2445_v59 = vpack.c.bf16 %v1337_v56, %v1335_v55  ;;  %v1375_v56 = vld [vmem:[#allocation8 + $0x3a0] sm:$0xff] }
 0x1c8   :  { %2402 = vmatpush1.bf16.msra.mxu0 %v2401_v63  ;;  %v2507_v63 = vpack.c.bf16 %v1566_v61, %v1565_v60  ;;  %2506 = vmatpush3.bf16.msra.mxu1 %v2505_v62  ;;  %v2447_v60 = vpack.c.bf16 %v1342_v58, %v1340_v57  ;;  %v1339_v61 = vld [vmem:[#allocation8 + $0x280] sm:$0xff]  ;;  %v1341_v62 = vld [vmem:[#allocation8 + $0x290] sm:$0xff]  ;;  %v1380_v58 = vld [vmem:[#allocation8 + $0x3c8] sm:$0xff] }
 0x1c9   :  { %2404 = vmatprep.subr.bf16.mxu0 %v2403_v0  ;;  %v1549_v0 = vld [vmem:[#allocation11 + $0x30] sm:$0xff] }
 0x1ca   :  { %v2509_v4 = vpack.c.bf16 %v1550_v1, %v1549_v0  ;;  %2508 = vmatprep.subr.bf16.mxu1 %v2507_v63  ;;  %v1344_v63 = vld [vmem:[#allocation8 + $0x2a8] sm:$0xff]  ;;  %v1346_v0 = vld [vmem:[#allocation8 + $0x2b8] sm:$0xff]  ;;  %v2449_v1 = vpack.c.bf16 %v1341_v62, %v1339_v61  ;;  %v1377_v57 = vld [vmem:[#allocation8 + $0x3b0] sm:$0xff] }
 0x1cc   :  { %2406 = vmatpush1.bf16.msra.mxu0 %v2405_v5  ;;  %v2511_v5 = vpack.c.bf16 %v1568_v3, %v1567_v2  ;;  %2510 = vmatpush3.bf16.msra.mxu1 %v2509_v4  ;;  %v2451_v2 = vpack.c.bf16 %v1346_v0, %v1344_v63  ;;  %v1343_v3 = vld [vmem:[#allocation8 + $0x2a0] sm:$0xff]  ;;  %v1345_v4 = vld [vmem:[#allocation8 + $0x2b0] sm:$0xff] }
 0x1cd   :  { %2408 = vmatprep.subr.bf16.mxu0 %v2407_v6  ;;  %v1551_v6 = vld [vmem:[#allocation11 + $0x40] sm:$0xff]  ;;  %v1381_v0 = vld [vmem:[#allocation8 + $0x3d0] sm:$0xff] }
 0x1ce   :  { %v2513_v10 = vpack.c.bf16 %v1552_v7, %v1551_v6  ;;  %2512 = vmatprep.subr.bf16.mxu1 %v2511_v5  ;;  %v1348_v5 = vld [vmem:[#allocation8 + $0x2c8] sm:$0xff]  ;;  %v1350_v6 = vld [vmem:[#allocation8 + $0x2d8] sm:$0xff]  ;;  %v2453_v7 = vpack.c.bf16 %v1345_v4, %v1343_v3  ;;  %v1379_v63 = vld [vmem:[#allocation8 + $0x3c0] sm:$0xff] }
 0x1cf   :  { %v2489_v3 = vpack.c.bf16 %v1381_v0, %v1379_v63 }
 0x1d0   :  { %2410 = vmatpush1.bf16.msra.mxu0 %v2409_v11  ;;  %v2515_v11 = vpack.c.bf16 %v1570_v9, %v1569_v8  ;;  %2514 = vmatpush3.bf16.msra.mxu1 %v2513_v10  ;;  %v2455_v8 = vpack.c.bf16 %v1350_v6, %v1348_v5  ;;  %v1347_v9 = vld [vmem:[#allocation8 + $0x2c0] sm:$0xff]  ;;  %v1349_v10 = vld [vmem:[#allocation8 + $0x2d0] sm:$0xff] }
 0x1d1   :  { %2412 = vmatprep.subr.bf16.mxu0 %v2411_v12  ;;  %v1553_v12 = vld [vmem:[#allocation11 + $0x50] sm:$0xff]  ;;  %v1383_v6 = vld [vmem:[#allocation8 + $0x3e0] sm:$0xff] }
 0x1d2   :  { %v2517_v16 = vpack.c.bf16 %v1554_v13, %v1553_v12  ;;  %2516 = vmatprep.subr.bf16.mxu1 %v2515_v11  ;;  %v1352_v11 = vld [vmem:[#allocation8 + $0x2e8] sm:$0xff]  ;;  %v1354_v12 = vld [vmem:[#allocation8 + $0x2f8] sm:$0xff]  ;;  %v2457_v13 = vpack.c.bf16 %v1349_v10, %v1347_v9 }
 0x1d4   :  { %2414 = vmatpush1.bf16.msra.mxu0 %v2413_v17  ;;  %v2519_v17 = vpack.c.bf16 %v1572_v15, %v1571_v14  ;;  %2518 = vmatpush3.bf16.msra.mxu1 %v2517_v16  ;;  %v2459_v14 = vpack.c.bf16 %v1354_v12, %v1352_v11  ;;  %v1351_v15 = vld [vmem:[#allocation8 + $0x2e0] sm:$0xff]  ;;  %v1353_v16 = vld [vmem:[#allocation8 + $0x2f0] sm:$0xff] }
 0x1d5   :  { %2416 = vmatprep.subr.bf16.mxu0 %v2415_v18  ;;  %v667_v18 = vlaneseq  ;;  %v1555_v11 = vld [vmem:[#allocation11 + $0x60] sm:$0xff]  ;;  %v1556_v12 = vld [vmem:[#allocation11 + $0x68] sm:$0xff] }
 0x1d6   :  { %2520 = vmatprep.subr.bf16.mxu1 %v2519_v17  ;;  %v1356_v17 = vld [vmem:[#allocation8 + $0x308] sm:$0xff] }
 0x1d7   :  { %v2999_v19 = vshrl.u32 %v667_v18, 7  ;;  %v1358_v18 = vld [vmem:[#allocation8 + $0x318] sm:$0xff] }
 0x1d8   :  { %2418 = vmatpush1.bf16.msra.mxu0 %v2417_v23 }
 0x1d9   :  { %2420 = vmatprep.subr.bf16.mxu0 %v2419_v24  ;;  %v669_v20 = vsub.s32 0, %v2999_v19  ;;  %v673_v22 = vsub.s32 1, %v2999_v19  ;;  %v681_v23 = vsub.s32 3, %v2999_v19  ;;  %v677_v61 = vsub.s32 2, %v2999_v19 }
 0x1db   :  { %v670_v24 = vrot.slane %v3002_v21, %v669_v20  ;;  %v674_v25 = vrot.slane %v3002_v21, %v673_v22  ;;  %v682_v26 = vrot.slane %v3002_v21, %v681_v23  ;;  %v2461_v23 = vpack.c.bf16 %v1353_v16, %v1351_v15  ;;  %v1574_v15 = vld [vmem:[#allocation11 + $0xf8] sm:$0xff] }
 0x1dc   :  { %2422 = vmatpush1.bf16.msra.mxu0 %v2421_v29  ;;  %v678_v4 = vrot.slane %v3002_v21, %v677_v61  ;;  %v1557_v21 = vld [vmem:[#allocation11 + $0x70] sm:$0xff]  ;;  %v1767_v61 = vld [vmem:[#allocation16] ss:$0 sm:$0xff] }
 0x1dd   :  { %2424 = vmatprep.subr.bf16.mxu0 %v2423_v30 }
 0x1e0   :  { %2426 = vmatpush1.bf16.msra.mxu0 %v2425_v33 }
 0x1e1   :  { %2428 = vmatprep.subr.bf16.mxu0 %v2427_v36  ;;  %v1330_v36 = vld [vmem:[#allocation8 + $0x238] sm:$0xff] }
 0x1e2   :  { %v2435_v41 = vpack.c.bf16 %v1330_v36, %v1328_v35  ;;  %v1366_v35 = vld [vmem:[#allocation8 + $0x358] sm:$0xff] }
 0x1e4   :  { %2430 = vmatpush1.bf16.msra.mxu0 %v2429_v39  ;;  %v2433_v39 = vpack.c.bf16 %v1325_v32, %v1323_v31  ;;  %v1359_v32 = vld [vmem:[#allocation8 + $0x320] sm:$0xff] }
 0x1e5   :  { %2432 = vmatprep.subr.bf16.mxu0 %v2431_v42  ;;  %v1327_v42 = vld [vmem:[#allocation8 + $0x220] sm:$0xff] }
 0x1e6   :  { %v2437_v47 = vpack.c.bf16 %v1329_v43, %v1327_v42 }
 0x27a   :  { %v966_v27 = vpop.f32.mrb[0].mxu0 }
 0x27b   :  { %v2551_v28 = vadd.f32 %v966_v27, %v670_v24  ;;  %v3013_v29 = vpop.f32.mrb[0].mxu1  ;;  %v968_v30 = vpop.f32.mrb[1].mxu0  ;;  %v2463_v24 = vpack.c.bf16 %v1358_v18, %v1356_v17  ;;  %v1360_v27 = vld [vmem:[#allocation8 + $0x328] sm:$0xff]  ;;  %v1558_v17 = vld [vmem:[#allocation11 + $0x78] sm:$0xff] }
 0x27c   :  { %v2552_v33 = vadd.f32 %v968_v30, %v674_v25  ;;  %v1252_v34 = vpop.f32.mrb[1].mxu1  ;;  %v1355_v25 = vld [vmem:[#allocation8 + $0x300] sm:$0xff]  ;;  %v2553_v9 = vadd.f32 %v3013_v29, %v678_v4  ;;  %v2525_v18 = vpack.c.bf16 %v1558_v17, %v1557_v21 }
 0x27d   :  { %v2554_v37 = vadd.f32 %v1252_v34, %v682_v26  ;;  %v1255_v40 = vmax.f32 %v2551_v28, 0.0  ;;  %v1357_v26 = vld [vmem:[#allocation8 + $0x310] sm:$0xff]  ;;  %v1362_v28 = vld [vmem:[#allocation8 + $0x338] sm:$0xff]  ;;  %v1364_v34 = vld [vmem:[#allocation8 + $0x348] sm:$0xff] }
 0x27e   :  { %v1256_v38 = vmax.f32 %v2552_v33, 0.0  ;;  %v2465_v30 = vpack.c.bf16 %v1357_v26, %v1355_v25  ;;  %v2467_v31 = vpack.c.bf16 %v1362_v28, %v1360_v27  ;;  %v1361_v33 = vld [vmem:[#allocation8 + $0x330] sm:$0xff]  ;;  %v1257_v10 = vmax.f32 %v2553_v9, 0.0 }
 0x27f   :  { %v1258_v44 = vmax.f32 %v2554_v37, 0.0  ;;  %v2469_v36 = vpack.c.bf16 %v1361_v33, %v1359_v32  ;;  %v2471_v37 = vpack.c.bf16 %v1366_v35, %v1364_v34 }
 0x280   :  { %1463 = vmatprep.mubr.f32.mxu0 %v1256_v38  ;;  %v1363_v38 = vld [vmem:[#allocation8 + $0x340] sm:$0xff] }
 0x281   :  { %1464 = vmatmul.mubr.f32.vlgmr.msra.gmra.mrb[2].mxu0 %v1255_v40  ;;  %v1368_v40 = vld [vmem:[#allocation8 + $0x368] sm:$0xff] }
 0x282   :  { %2434 = vmatpush1.bf16.msra.mxu0 %v2433_v39  ;;  %1534 = vmatprep.mubr.f32.mxu0 %v1258_v44  ;;  %v1365_v39 = vld [vmem:[#allocation8 + $0x350] sm:$0xff]  ;;  %v1367_v44 = vld [vmem:[#allocation8 + $0x360] sm:$0xff] }
 0x283   :  { %2436 = vmatprep.subr.bf16.mxu0 %v2435_v41  ;;  %v1370_v41 = vld [vmem:[#allocation8 + $0x378] sm:$0xff]  ;;  %v2473_v42 = vpack.c.bf16 %v1365_v39, %v1363_v38  ;;  %v1658_v39 = vld [vmem:[#allocation14 + $0x28] sm:$0xff] }
 0x284   :  { %v2475_v43 = vpack.c.bf16 %v1370_v41, %v1368_v40  ;;  %v1660_v40 = vld [vmem:[#allocation14 + $0x38] sm:$0xff] }
 0x286   :  { %2438 = vmatpush1.bf16.msra.mxu0 %v2437_v47  ;;  %v1374_v47 = vld [vmem:[#allocation8 + $0x398] sm:$0xff] }
 0x287   :  { %2440 = vmatprep.subr.bf16.mxu0 %v2439_v48  ;;  %v2477_v48 = vpack.c.bf16 %v1369_v45, %v1367_v44  ;;  %v2479_v49 = vpack.c.bf16 %v1374_v47, %v1372_v46  ;;  %v1663_v45 = vld [vmem:[#allocation14 + $0x50] sm:$0xff]  ;;  %v1664_v46 = vld [vmem:[#allocation14 + $0x58] sm:$0xff] }
 0x288   :  { %v2543_v47 = vpack.c.bf16 %v1664_v46, %v1663_v45 }
 0x28a   :  { %2442 = vmatpush1.bf16.msra.mxu0 %v2441_v53  ;;  %v1378_v53 = vld [vmem:[#allocation8 + $0x3b8] sm:$0xff] }
 0x28b   :  { %2444 = vmatprep.subr.bf16.mxu0 %v2443_v54  ;;  %v2481_v54 = vpack.c.bf16 %v1373_v51, %v1371_v50  ;;  %v2483_v55 = vpack.c.bf16 %v1378_v53, %v1376_v52  ;;  %v1667_v51 = vld [vmem:[#allocation14 + $0x70] sm:$0xff]  ;;  %v1668_v52 = vld [vmem:[#allocation14 + $0x78] sm:$0xff] }
 0x28c   :  { %v2549_v53 = vpack.c.bf16 %v1668_v52, %v1667_v51 }
 0x28e   :  { %2446 = vmatpush1.bf16.msra.mxu0 %v2445_v59  ;;  %v1382_v59 = vld [vmem:[#allocation8 + $0x3d8] sm:$0xff] }
 0x28f   :  { %2448 = vmatprep.subr.bf16.mxu0 %v2447_v60  ;;  %v2485_v60 = vpack.c.bf16 %v1377_v57, %v1375_v56  ;;  %v2487_v62 = vpack.c.bf16 %v1382_v59, %v1380_v58  ;;  %v1766_v56 = vld [vmem:[#allocation13] ss:$0 sm:$0xff] }
 0x292   :  { %2450 = vmatpush1.bf16.msra.mxu0 %v2449_v1  ;;  %v1384_v1 = vld [vmem:[#allocation8 + $0x3e8] sm:$0xff] }
 0x293   :  { %2452 = vmatprep.subr.bf16.mxu0 %v2451_v2  ;;  %v1386_v2 = vld [vmem:[#allocation8 + $0x3f8] sm:$0xff] }
 0x294   :  { %v2491_v5 = vpack.c.bf16 %v1386_v2, %v1384_v1 }
 0x296   :  { %2454 = vmatpush1.bf16.msra.mxu0 %v2453_v7  ;;  %v1385_v7 = vld [vmem:[#allocation8 + $0x3f0] sm:$0xff] }
 0x297   :  { %2456 = vmatprep.subr.bf16.mxu0 %v2455_v8  ;;  %v2493_v8 = vpack.c.bf16 %v1385_v7, %v1383_v6 }
 0x29a   :  { %2458 = vmatpush1.bf16.msra.mxu0 %v2457_v13  ;;  %v2521_v13 = vpack.c.bf16 %v1556_v12, %v1555_v11 }
 0x29b   :  { %2460 = vmatprep.subr.bf16.mxu0 %v2459_v14  ;;  %v1573_v14 = vld [vmem:[#allocation11 + $0xf0] sm:$0xff] }
 0x29c   :  { %2522 = vmatpush3.bf16.msra.mxu1 %v2521_v13  ;;  %v2523_v16 = vpack.c.bf16 %v1574_v15, %v1573_v14 }
 0x29e   :  { %2462 = vmatpush1.bf16.msra.mxu0 %v2461_v23  ;;  %2524 = vmatprep.subr.bf16.mxu1 %v2523_v16  ;;  %v2837_v23 = vmov 0.0|0.0  }
 0x29f   :  { %2464 = vmatprep.subr.bf16.mxu0 %v2463_v24  ;;  %v1387_v24 = vld [vmem:[#allocation10] sm:$0x3] }
 0x2a0   :  { %2526 = vmatpush3.bf16.msra.mxu1 %v2525_v18  ;;  %v1392_v29 = vrot.slane %v1387_v24, %v669_v20  ;;  %v1396_v25 = vrot.slane %v1387_v24, %v673_v22  ;;  %v1657_v20 = vld [vmem:[#allocation14 + $0x20] sm:$0xff]  ;;  %v1659_v22 = vld [vmem:[#allocation14 + $0x30] sm:$0xff] }
 0x2a1   :  { %2527 = vmatprep.subr.bf16.mxu1 %v2837_v23  ;;  %v2534_v19 = vpack.c.bf16 %v1658_v39, %v1657_v20  ;;  %v2537_v41 = vpack.c.bf16 %v1660_v40, %v1659_v22 }
 0x2a2   :  { %2466 = vmatpush1.bf16.msra.mxu0 %v2465_v30  ;;  %v1653_v30 = vld [vmem:[#allocation14] sm:$0xff] }
 0x2a3   :  { %2468 = vmatprep.subr.bf16.mxu0 %v2467_v31  ;;  %v1654_v31 = vld [vmem:[#allocation14 + $0x8] sm:$0xff] }
 0x2a4   :  { %v2528_v34 = vpack.c.bf16 %v1654_v31, %v1653_v30 }
 0x2a6   :  { %2470 = vmatpush1.bf16.msra.mxu0 %v2469_v36  ;;  %v1655_v36 = vld [vmem:[#allocation14 + $0x10] sm:$0xff] }
 0x2a7   :  { %2472 = vmatprep.subr.bf16.mxu0 %v2471_v37  ;;  %v1656_v37 = vld [vmem:[#allocation14 + $0x18] sm:$0xff] }
 0x2a8   :  { %v2531_v38 = vpack.c.bf16 %v1656_v37, %v1655_v36 }
 0x2aa   :  { %2474 = vmatpush1.bf16.msra.mxu0 %v2473_v42  ;;  %v1661_v42 = vld [vmem:[#allocation14 + $0x40] sm:$0xff] }
 0x2ab   :  { %2476 = vmatprep.subr.bf16.mxu0 %v2475_v43  ;;  %v1662_v43 = vld [vmem:[#allocation14 + $0x48] sm:$0xff] }
 0x2ac   :  { %v2540_v44 = vpack.c.bf16 %v1662_v43, %v1661_v42 }
 0x2ae   :  { %2478 = vmatpush1.bf16.msra.mxu0 %v2477_v48  ;;  %v1665_v48 = vld [vmem:[#allocation14 + $0x60] sm:$0xff] }
 0x2af   :  { %2480 = vmatprep.subr.bf16.mxu0 %v2479_v49  ;;  %v1666_v49 = vld [vmem:[#allocation14 + $0x68] sm:$0xff] }
 0x2b0   :  { %v2546_v50 = vpack.c.bf16 %v1666_v49, %v1665_v48 }
 0x2b2   :  { %2482 = vmatpush1.bf16.msra.mxu0 %v2481_v54  ;;  %v2839_v54 = vmov 0.0  }
 0x2b3   :  { %2484 = vmatprep.subr.bf16.mxu0 %v2483_v55 }
 0x2b6   :  { %2486 = vmatpush1.bf16.msra.mxu0 %v2485_v60 }
 0x2b7   :  { %2488 = vmatprep.subr.bf16.mxu0 %v2487_v62 }
 0x2ba   :  { %2490 = vmatpush1.bf16.msra.mxu0 %v2489_v3 }
 0x2bb   :  { %2492 = vmatprep.subr.bf16.mxu0 %v2491_v5 }
 0x2be   :  { %2494 = vmatpush1.bf16.msra.mxu0 %v2493_v8 }
 0x2c1   :  { %1535 = vmatmul.mubr.f32.vlgmr.msra.gmra.mrb[2].mxu0 %v1257_v10 }
 0x394   :  { %v1536_v26 = vpop.f32.mrb[2].mxu0 }
 0x395   :  { %v2555_v27 = vadd.f32 %v1536_v26, %v1392_v29  ;;  %v1538_v28 = vpop.f32.mrb[3].mxu0 }
 0x396   :  { %v2556_v32 = vadd.f32 %v1538_v28, %v1396_v25 }
 0x397   :  { %v1541_v35 = vmax.f32 %v2555_v27, 0.0 }
 0x398   :  { %v1542_v33 = vmax.f32 %v2556_v32, 0.0 }
 0x39a   :  { %1646 = vmatprep.mubr.f32.mxu1 %v1542_v33 }
 0x39b   :  { %1647 = vmatmul.mubr.f32.vlgmr.msra.gmra.mrb[2].mxu1 %v1541_v35 }
 0x39c   :  { %2529 = vmatpush3.bf16.msra.mxu1 %v2528_v34  ;;  %1852 = vmatprep.mubr.msk.f32.mxu1 %vm2838_vm0, %v2839_v54 }
 0x39d   :  { %2530 = vmatprep.subr.bf16.mxu1 %v2837_v23 }
 0x3a0   :  { %2532 = vmatpush3.bf16.msra.mxu1 %v2531_v38 }
 0x3a1   :  { %2533 = vmatprep.subr.bf16.mxu1 %v2837_v23 }
 0x3a4   :  { %2535 = vmatpush3.bf16.msra.mxu1 %v2534_v19 }
 0x3a5   :  { %2536 = vmatprep.subr.bf16.mxu1 %v2837_v23 }
 0x3a8   :  { %2538 = vmatpush3.bf16.msra.mxu1 %v2537_v41 }
 0x3a9   :  { %2539 = vmatprep.subr.bf16.mxu1 %v2837_v23 }
 0x3ac   :  { %2541 = vmatpush3.bf16.msra.mxu1 %v2540_v44 }
 0x3ad   :  { %2542 = vmatprep.subr.bf16.mxu1 %v2837_v23 }
 0x3b0   :  { %2544 = vmatpush3.bf16.msra.mxu1 %v2543_v47 }
 0x3b1   :  { %2545 = vmatprep.subr.bf16.mxu1 %v2837_v23 }
 0x3b4   :  { %2547 = vmatpush3.bf16.msra.mxu1 %v2546_v50 }
 0x3b5   :  { %2548 = vmatprep.subr.bf16.mxu1 %v2837_v23 }
 0x3b8   :  { %2550 = vmatpush3.bf16.msra.mxu1 %v2549_v53 }
 0x46e   :  { %v1800_v55 = vpop.f32.mrb[2].mxu1 }
 0x46f   :  { %v1801_v57 = vpop.f32.mrb[3].mxu1 }
 0x470   :  { %v1802_v58 = vadd.f32 %v1801_v57, %v1800_v55 }
 0x472   :  { %v1649_v59 = vadd.f32 %v1802_v58, %v1766_v56 }
 0x474   :  { %v1652_v60 = vmax.f32 %v1649_v59, 0.0 }
 0x476   :  { %1853 = vmatmul.mubr.f32.vlgmr.msra.gmra.mrb[4].mxu1 %v1652_v60 }
 0x549   :  { %v1742_v62 = vpop.f32.mrb[4].mxu1 }
 0x54a   :  { %v1743_v63 = vadd.f32 %v1767_v61, %v1742_v62  ;;  %v1854_v0 = vpop.f32.mrb[5].mxu1 }
 0x54c   :  { %1746 = vst [vmem:[#allocation17] sm:$0xff] %v1743_v63 }
 0x54d   :  { %2799 = shalt.err (!%p2796_p6)
}
 0x54e   :  { %s2800_s7 = scalar_lea.hbm %s3043_s9, 128 }
 0x54f   :  { %p2801_p7 = scmp.ne.s32.totalorder %s3043_s9, %s2800_s7  ;;  %p2804_p8 = scmp.lt.u32.totalorder %s2800_s7, %s3043_s9 }
 0x551   :  { %p2806_p9 = pnand %p2804_p8, %p2801_p7 }
 0x553   :  { %2809 = shalt.err (!%p2806_p9)
}
 0x554   :  { %1756 = dma.vmem_to_hbm [thread:$0]  %s1754_s25, 128, %s3043_s9, [#allocation4]  }
 0x555   :  { %2820 = dma.done.wait [#allocation4], 128  }
 0x556   :  { %2821 = vsyncadd [#allocation4], 4294967168 }
 0x557   :  { %1760 = vsyncpa [#allocation3], 1 }
 0x558   :  { %1761 = vsyncpa [#allocation6], 1 }
 0x559   :  { %1762 = vsyncpa [#allocation9], 1 }
 0x55a   :  { %1763 = vsyncpa [#allocation12], 1 }
 0x55b   :  { %1764 = vsyncpa [#allocation15], 1 }
 0x55c   :  { %1765 = vsyncpa [#allocation4], 1 }

</bundles_post_ra>
